<compile_context>
chip_gen: v7x
topology: tpu7x:2x2x1
jax: 0.10.0
libtpu: 0.0.40
codegen_flags: <defaults>
</compile_context>

<pallas_src>
import functools

import jax
import jax.numpy as jnp
import numpy as np
from jax.experimental import pallas as pl
from jax.experimental.pallas import tpu as pltpu


def _round_up(x, m):
    return ((x + m - 1) // m) * m


def _num_tensorcores():
    """2 on v7x (2 TCs/chip), else 1.  Used only to pick the batch tiling."""
    try:
        kind = jax.devices()[0].device_kind.lower()
    except Exception:
        return 1
    return 2 if ("v7" in kind or "7x" in kind) else 1


def _srel_kernel(xin_ref, w1top_ref, w1c_ref, b1_ref, w2f_ref, b2f_ref,
                 out_ref, const_ref,
                 *, n_step, modulus, ls, hidden, mm_dtype):
    """One batch tile of the unrolled SREL recurrence.

    xin = [phi | phi | w.real | w.imag | y].  phi is carried duplicated
    (phi2 = [phi, phi]) so modulus * cos(phi2 + [0, -pi/2]) == [Re(s), Im(s)]
    with no per-step concatenate, and the fused layer-2 output columns
    [eta | eta | rho..rho] keep both halves identical through the update.
    """
    two_ls = 2 * ls
    four_ls = 4 * ls
    h2 = 2 * hidden
    g_base = (n_step + 1) * two_ls          # lane offset of the layer-2 slabs
    l_used = g_base + n_step * four_ls

    # lane offset turning cos into sin on the imaginary half (loop-invariant)
    lane = jax.lax.broadcasted_iota(jnp.int32, (1, two_ls), 1)
    off = jnp.where(lane >= ls, -0.5 * jnp.pi, 0.0).astype(jnp.float32)

    phi2 = xin_ref[:, :two_ls]                                  # (TB, 2Ls)
    xc = xin_ref[:, two_ls:]                                    # (TB, Dc)

    # zero the unused padding lanes of the merged output (kept lane-dense)
    pad_w = out_ref.shape[1] - l_used
    if pad_w:
        out_ref[:, l_used:] = jnp.zeros((out_ref.shape[0], pad_w), jnp.float32)

    # phi-independent layer-1 contribution (+ bias) for every step and both
    # heads, into a step-indexed VMEM scratch.  Off the serial phi critical
    # path, so it stays f32 even when the in-loop matmuls run in bf16.
    for step in range(n_step):
        const_ref[step] = (
            jnp.dot(xc, w1c_ref[step], preferred_element_type=jnp.float32)
            + b1_ref[step])

    # TODO(synk): if n_step grows beyond ~8, replace this static unroll with a
    # trailing "arbitrary" grid axis (phi2 carried in a VMEM scratch) so vreg
    # live ranges stay bounded and per-step weights get pipelined.
    for step in range(n_step):
        ss = modulus * jnp.cos(phi2 + off)                      # [Re(s)|Im(s)]
        out_ref[:, step * two_ls:(step + 1) * two_ls] = ss

        # layer 1 (eta|rho heads fused), phi-dependent half only
        h = jnp.dot(ss.astype(mm_dtype), w1top_ref[step],
                    preferred_element_type=jnp.float32)
        h = jnp.maximum(h + const_ref[step], 0.0)               # (TB, 2H)

        # layer 2, both heads in ONE MXU matmul:
        #   columns = [eta(Ls) | eta(Ls) | rho pre-sigmoid, replicated 2Ls]
        o2 = jnp.dot(h.astype(mm_dtype), w2f_ref[step],
                     preferred_element_type=jnp.float32) + b2f_ref[step]
        out_ref[:, g_base + step * four_ls:
                   g_base + (step + 1) * four_ls] = o2

        eta2 = o2[:, :two_ls]                                   # [eta | eta]
        rho2 = jax.nn.sigmoid(o2[:, two_ls:])                   # rho, replicated
        phi2 = phi2 - rho2 * eta2

    out_ref[:, n_step * two_ls:(n_step + 1) * two_ls] = (
        modulus * jnp.cos(phi2 + off))


def _prepare_fused_params(params, *, n_step, ls, hidden, mm_dtype):
    """Fuse / reshape raw (in, out) weights into the kernel's layout."""
    two_ls = 2 * ls
    w1e, b1e = params["w1_eta"], params["b1_eta"]      # (n,D,H), (n,1,H)
    w2e, b2e = params["w2_eta"], params["b2_eta"]      # (n,H,Ls), (n,1,Ls)
    w1r, b1r = params["w1_rho"], params["b1_rho"]      # (D,H), (1,H)
    w2r, b2r = params["w2_rho"], params["b2_rho"]      # (H,1), (1,1)

    # layer 1: fuse eta/rho heads column-wise -> (n, D, 2H); split the rows
    # into the phi-dependent top (first 2Ls rows) and the constant bottom.
    w1r_b = jnp.broadcast_to(w1r[None], (n_step,) + w1r.shape)
    w1_fused = jnp.concatenate([w1e, w1r_b], axis=-1)           # (n, D, 2H)
    w1_top = w1_fused[:, :two_ls, :]                            # (n, 2Ls, 2H)
    w1_bot = w1_fused[:, two_ls:, :]                            # (n, Dc, 2H)
    b1r_b = jnp.broadcast_to(b1r[None], (n_step,) + b1r.shape)
    b1 = jnp.concatenate([b1e, b1r_b], axis=-1)                 # (n, 1, 2H)

    # layer 2 fused (eta + rho in one matmul):
    #   rows = [h_eta | h_rho] (2H), cols = [eta | eta | rho .. rho] (4Ls)
    zeros_hl = jnp.zeros((n_step, hidden, two_ls), w2e.dtype)
    top = jnp.concatenate([w2e, w2e, zeros_hl], axis=-1)        # (n, H, 4Ls)
    w2r_rep = jnp.broadcast_to(w2r.reshape(1, hidden, 1),
                               (n_step, hidden, two_ls))
    bot = jnp.concatenate([zeros_hl, w2r_rep], axis=-1)         # (n, H, 4Ls)
    w2_fused = jnp.concatenate([top, bot], axis=1)              # (n, 2H, 4Ls)
    b2r_rep = jnp.broadcast_to(b2r.reshape(1, 1, 1), (n_step, 1, two_ls))
    b2_fused = jnp.concatenate([b2e, b2e, b2r_rep], axis=-1)    # (n, 1, 4Ls)

    return dict(
        w1_top=w1_top.astype(mm_dtype),
        w1_bot=w1_bot.astype(jnp.float32),      # prologue matmul stays f32
        b1=b1.astype(jnp.float32),
        w2_fused=w2_fused.astype(mm_dtype),
        b2_fused=b2_fused.astype(jnp.float32),
    )


def srel_rep_rho_intra_forward(phi_batch, w_batch, y, params, *, n_step,
                               modulus, mm_dtype=jnp.bfloat16, batch_tile=256):
    """JAX wrapper reproducing SREL_rep_rho_intra.forward semantics.

    mm_dtype: dtype of the in-loop MXU operands (bf16 by default; use
    jnp.float32 for bit-accurate parity and on v5e where the per-step casts
    are pure overhead).  Accumulation and all elementwise math are f32.
    """
    B, Ls = phi_batch.shape
    Ly = y.shape[-1]
    hidden = params["w1_rho"].shape[1]
    two_ls = 2 * Ls
    four_ls = 4 * Ls

    phi = phi_batch.astype(jnp.float32)
    wr = jnp.real(w_batch).astype(jnp.float32)
    wi = jnp.imag(w_batch).astype(jnp.float32)
    yb = jnp.broadcast_to(y.reshape(1, -1).astype(jnp.float32), (B, Ly))

    # single lane-dense input: [phi | phi | w.real | w.imag | y]
    xin = jnp.concatenate([phi, phi, wr, wi, yb], axis=1)       # (B, Din)
    Din = xin.shape[1]

    # batch tiling: sublane-friendly, >= num_tc tiles on v7x, large tiles to
    # amortize MXU weight-reload latency and per-grid-step overhead.
    num_tc = _num_tensorcores()
    if B > batch_tile * num_tc:
        TB = batch_tile
        B_pad = _round_up(B, TB)
    else:
        n_split = num_tc if B > 1 else 1
        TB = max(8, _round_up(-(-B // n_split), 8))
        B_pad = TB * n_split
    n_tiles = B_pad // TB

    pad = B_pad - B
    if pad:
        # padded rows compute on zeros and are sliced off below (benign)
        xin = jnp.pad(xin, ((0, pad), (0, 0)))

    fused = _prepare_fused_params(params, n_step=n_step, ls=Ls, hidden=hidden,
                                  mm_dtype=mm_dtype)

    # merged lane-dense output: [ss step 0..n | raw layer-2 out step 0..n-1]
    g_base = (n_step + 1) * two_ls
    L_used = g_base + n_step * four_ls
    L_out = _round_up(L_used, 128)

    kernel = functools.partial(_srel_kernel, n_step=n_step,
                               modulus=float(modulus), ls=Ls, hidden=hidden,
                               mm_dtype=mm_dtype)

    def resident(arr):
        nd = arr.ndim
        return pl.BlockSpec(arr.shape, lambda i, _nd=nd: (0,) * _nd)

    merged = pl.pallas_call(
        kernel,
        out_shape=jax.ShapeDtypeStruct((B_pad, L_out), jnp.float32),
        grid=(n_tiles,),
        in_specs=[
            pl.BlockSpec((TB, Din), lambda i: (i, 0)),          # [phi2 | xc]
            resident(fused["w1_top"]),
            resident(fused["w1_bot"]),
            resident(fused["b1"]),
            resident(fused["w2_fused"]),
            resident(fused["b2_fused"]),
        ],
        out_specs=pl.BlockSpec((TB, L_out), lambda i: (i, 0)),
        scratch_shapes=[pltpu.VMEM((n_step, TB, 2 * hidden), jnp.float32)],
        compiler_params=pltpu.CompilerParams(
            dimension_semantics=("parallel",)),
    )(xin, fused["w1_top"], fused["w1_bot"], fused["b1"],
      fused["w2_fused"], fused["b2_fused"])

    # layout fixup (plumbing only) in the wrapper
    merged = merged[:B]
    ss_all = merged[:, :g_base].reshape(B, n_step + 1, two_ls)
    s_stack = (ss_all[..., :Ls] + 1j * ss_all[..., Ls:]).astype(jnp.complex64)
    o2_all = merged[:, g_base:g_base + n_step * four_ls].reshape(
        B, n_step, four_ls)
    eta_stack = o2_all[..., :Ls]
    rho_stack = jax.nn.sigmoid(o2_all[..., two_ls])             # (B, n_step)
    return {
        "s_stack_batch": s_stack,
        "eta_stack_batch": eta_stack,
        "rho_stack_batch": rho_stack,
    }


def srel_reference(phi_batch, w_batch, y, params, *, n_step, modulus):
    """Pure-JAX reference (same guessed sub-module architecture)."""
    B, Ls = phi_batch.shape
    wr = jnp.real(w_batch).astype(jnp.float32)
    wi = jnp.imag(w_batch).astype(jnp.float32)
    yb = jnp.broadcast_to(y.reshape(1, -1).astype(jnp.float32), (B, y.shape[-1]))
    phi = phi_batch.astype(jnp.float32)
    sr_l, si_l, eta_l, rho_l = [], [], [], []
    for step in range(n_step):
        sr, si = modulus * jnp.cos(phi), modulus * jnp.sin(phi)
        x = jnp.concatenate([sr, si, wr, wi, yb], axis=1)
        h = jnp.maximum(x @ params["w1_eta"][step] + params["b1_eta"][step], 0.0)
        eta = h @ params["w2_eta"][step] + params["b2_eta"][step]
        hr = jnp.maximum(x @ params["w1_rho"] + params["b1_rho"], 0.0)
        rho = jax.nn.sigmoid(hr @ params["w2_rho"] + params["b2_rho"])
        phi = phi - rho * eta
        sr_l.append(sr); si_l.append(si); eta_l.append(eta); rho_l.append(rho)
    sr_l.append(modulus * jnp.cos(phi)); si_l.append(modulus * jnp.sin(phi))
    s = jnp.stack(sr_l, 1) + 1j * jnp.stack(si_l, 1)
    return {"s_stack_batch": s.astype(jnp.complex64),
            "eta_stack_batch": jnp.stack(eta_l, 1),
            "rho_stack_batch": jnp.concatenate(rho_l, 1)}


def init_params(key, *, n_step, in_dim, hidden, ls):
    """Deterministic synthetic parameters (weights stored as (in, out))."""
    ks = jax.random.split(key, 8)
    sc1 = 1.0 / jnp.sqrt(in_dim)
    sc2 = 1.0 / jnp.sqrt(hidden)
    return {
        "w1_eta": sc1 * jax.random.normal(ks[0], (n_step, in_dim, hidden), jnp.float32),
        "b1_eta": 0.01 * jax.random.normal(ks[1], (n_step, 1, hidden), jnp.float32),
        "w2_eta": sc2 * jax.random.normal(ks[2], (n_step, hidden, ls), jnp.float32),
        "b2_eta": 0.01 * jax.random.normal(ks[3], (n_step, 1, ls), jnp.float32),
        "w1_rho": sc1 * jax.random.normal(ks[4], (in_dim, hidden), jnp.float32),
        "b1_rho": 0.01 * jax.random.normal(ks[5], (1, hidden), jnp.float32),
        "w2_rho": sc2 * jax.random.normal(ks[6], (hidden, 1), jnp.float32),
        "b2_rho": 0.01 * jax.random.normal(ks[7], (1, 1), jnp.float32),
    }


if __name__ == "__main__":
    # constants: M=4 (unused in forward), Nt=2, N=8 -> Ls=16, Lw=8, Ly=16,
    # N_step=3, modulus=1.0
    constants = dict(M=4, Nt=2, N=8, Lw=8, Ly=16, N_step=3, modulus=1.0)
    Ls = constants["Nt"] * constants["N"]
    Lw, Ly, N_step = constants["Lw"], constants["Ly"], constants["N_step"]
    D = 2 * Ls + 2 * Lw + Ly
    hidden = 32
    B = 2

    key = jax.random.PRNGKey(0)
    k_phi, k_wr, k_wi, k_y, k_par = jax.random.split(key, 5)

    phi_batch = jax.random.uniform(k_phi, (B, Ls), jnp.float32,
                                   minval=-jnp.pi, maxval=jnp.pi)
    w_batch = (jax.random.normal(k_wr, (B, Lw), jnp.float32)
               + 1j * jax.random.normal(k_wi, (B, Lw), jnp.float32)).astype(jnp.complex64)
    y = jax.random.normal(k_y, (Ly,), jnp.float32)

    params = init_params(k_par, n_step=N_step, in_dim=D, hidden=hidden, ls=Ls)

    # fast path: bf16 MXU operands, f32 accumulation / elementwise
    outs = srel_rep_rho_intra_forward(
        phi_batch, w_batch, y, params,
        n_step=N_step, modulus=constants["modulus"])
    jax.block_until_ready(outs)

    assert outs["s_stack_batch"].shape == (B, N_step + 1, Ls)
    assert outs["s_stack_batch"].dtype == jnp.complex64
    assert outs["eta_stack_batch"].shape == (B, N_step, Ls)
    assert outs["rho_stack_batch"].shape == (B, N_step)

    # full-precision path checked against the pure-JAX reference
    outs_f32 = srel_rep_rho_intra_forward(
        phi_batch, w_batch, y, params,
        n_step=N_step, modulus=constants["modulus"], mm_dtype=jnp.float32)
    ref = srel_reference(phi_batch, w_batch, y, params,
                         n_step=N_step, modulus=constants["modulus"])
    np.testing.assert_allclose(np.asarray(outs_f32["s_stack_batch"]),
                               np.asarray(ref["s_stack_batch"]), atol=2e-3, rtol=2e-3)
    np.testing.assert_allclose(np.asarray(outs_f32["eta_stack_batch"]),
                               np.asarray(ref["eta_stack_batch"]), atol=2e-3, rtol=2e-3)
    np.testing.assert_allclose(np.asarray(outs_f32["rho_stack_batch"]),
                               np.asarray(ref["rho_stack_batch"]), atol=2e-3, rtol=2e-3)

    print("KERNEL_OK")
</pallas_src>

<mosaic_0001>
module attributes {stable_mosaic.version = 11 : i64} {
  func.func @_srel_kernel(%arg0: i32, %arg1: memref<8x64xf32, #tpu.memory_space<vmem>>, %arg2: memref<3x32x64xbf16, #tpu.memory_space<vmem>>, %arg3: memref<3x32x64xf32, #tpu.memory_space<vmem>>, %arg4: memref<3x1x64xf32, #tpu.memory_space<vmem>>, %arg5: memref<3x64x64xbf16, #tpu.memory_space<vmem>>, %arg6: memref<3x1x64xf32, #tpu.memory_space<vmem>>, %arg7: memref<8x384xf32, #tpu.memory_space<vmem>>, %arg8: memref<3x8x64xf32, #tpu.memory_space<vmem>>) attributes {dimension_semantics = [#tpu.dimension_semantics<parallel>], iteration_bounds = array<i64: 1>, scalar_prefetch = 0 : i64, scratch_operands = 1 : i64, tpu.core_type = #tpu.core_type<tc>, window_params = [{transform_indices = @transform_0, window_bounds = array<i64: 8, 64>}, {pipeline_mode = #tpu.pipeline_mode<synchronous>, transform_indices = @transform_1, window_bounds = array<i64: 3, 32, 64>}, {pipeline_mode = #tpu.pipeline_mode<synchronous>, transform_indices = @transform_2, window_bounds = array<i64: 3, 32, 64>}, {pipeline_mode = #tpu.pipeline_mode<synchronous>, transform_indices = @transform_3, window_bounds = array<i64: 3, 1, 64>}, {pipeline_mode = #tpu.pipeline_mode<synchronous>, transform_indices = @transform_4, window_bounds = array<i64: 3, 64, 64>}, {pipeline_mode = #tpu.pipeline_mode<synchronous>, transform_indices = @transform_5, window_bounds = array<i64: 3, 1, 64>}, {transform_indices = @transform_6, window_bounds = array<i64: 8, 384>}]} {
    %0 = tpu.iota {dimensions = array<i32: 1>} : vector<1x32xi32>
    %c16_i32 = arith.constant 16 : i32
    %1 = vector.broadcast %c16_i32 : i32 to vector<1x32xi32>
    %2 = arith.cmpi sge, %0, %1 : vector<1x32xi32>
    %cst = arith.constant -1.57079637 : f32
    %cst_0 = arith.constant 0.000000e+00 : f32
    %3 = vector.broadcast %cst : f32 to vector<1x32xf32>
    %4 = vector.broadcast %cst_0 : f32 to vector<1x32xf32>
    %5 = arith.select %2, %3, %4 : vector<1x32xi1>, vector<1x32xf32>
    %c0 = arith.constant 0 : index
    %c0_1 = arith.constant 0 : index
    %6 = vector.load %arg1[%c0, %c0_1] : memref<8x64xf32, #tpu.memory_space<vmem>>, vector<8x32xf32>
    %c0_2 = arith.constant 0 : index
    %c32 = arith.constant 32 : index
    %7 = vector.load %arg1[%c0_2, %c32] : memref<8x64xf32, #tpu.memory_space<vmem>>, vector<8x32xf32>
    %cst_3 = arith.constant 0.000000e+00 : f32
    %8 = vector.broadcast %cst_3 : f32 to vector<8x64xf32>
    %c0_4 = arith.constant 0 : index
    %c320 = arith.constant 320 : index
    %9 = vector.load %arg7[%c0_4, %c320] : memref<8x384xf32, #tpu.memory_space<vmem>>, vector<8x64xf32>
    tpu.vector_store %arg7[%c0_4, %c320], %8 {strides = array<i32>} : memref<8x384xf32, #tpu.memory_space<vmem>>, vector<8x64xf32>,
    %c0_5 = arith.constant 0 : index
    %c0_6 = arith.constant 0 : index
    %c0_7 = arith.constant 0 : index
    %10 = vector.load %arg3[%c0_5, %c0_6, %c0_7] : memref<3x32x64xf32, #tpu.memory_space<vmem>>, vector<1x32x64xf32>
    %11 = vector.shape_cast %10 : vector<1x32x64xf32> to vector<32x64xf32>
    %cst_8 = arith.constant dense<0.000000e+00> : vector<8x64xf32>
    %12 = tpu.matmul %7, %11, %cst_8 {dimension_numbers = #tpu.dot_dimension_numbers<[1], [0], [0], [1], [0, 0, 1, 1], [], []>} : vector<8x32xf32>, vector<32x64xf32>, vector<8x64xf32> -> vector<8x64xf32>
    %c0_9 = arith.constant 0 : index
    %c0_10 = arith.constant 0 : index
    %c0_11 = arith.constant 0 : index
    %13 = vector.load %arg4[%c0_9, %c0_10, %c0_11] : memref<3x1x64xf32, #tpu.memory_space<vmem>>, vector<1x1x64xf32>
    %14 = vector.shape_cast %13 : vector<1x1x64xf32> to vector<1x64xf32>
    %15 = vector.broadcast %14 : vector<1x64xf32> to vector<8x64xf32>
    %16 = arith.addf %12, %15 : vector<8x64xf32>
    %c0_12 = arith.constant 0 : index
    %c0_13 = arith.constant 0 : index
    %c0_14 = arith.constant 0 : index
    %17 = vector.load %arg8[%c0_12, %c0_13, %c0_14] : memref<3x8x64xf32, #tpu.memory_space<vmem>>, vector<1x8x64xf32>
    %18 = vector.shape_cast %17 : vector<1x8x64xf32> to vector<8x64xf32>
    %19 = vector.shape_cast %16 : vector<8x64xf32> to vector<1x8x64xf32>
    tpu.vector_store %arg8[%c0_12, %c0_13, %c0_14], %19 {strides = array<i32>} : memref<3x8x64xf32, #tpu.memory_space<vmem>>, vector<1x8x64xf32>,
    %c1 = arith.constant 1 : index
    %c0_15 = arith.constant 0 : index
    %c0_16 = arith.constant 0 : index
    %20 = vector.load %arg3[%c1, %c0_15, %c0_16] : memref<3x32x64xf32, #tpu.memory_space<vmem>>, vector<1x32x64xf32>
    %21 = vector.shape_cast %20 : vector<1x32x64xf32> to vector<32x64xf32>
    %cst_17 = arith.constant dense<0.000000e+00> : vector<8x64xf32>
    %22 = tpu.matmul %7, %21, %cst_17 {dimension_numbers = #tpu.dot_dimension_numbers<[1], [0], [0], [1], [0, 0, 1, 1], [], []>} : vector<8x32xf32>, vector<32x64xf32>, vector<8x64xf32> -> vector<8x64xf32>
    %c1_18 = arith.constant 1 : index
    %c0_19 = arith.constant 0 : index
    %c0_20 = arith.constant 0 : index
    %23 = vector.load %arg4[%c1_18, %c0_19, %c0_20] : memref<3x1x64xf32, #tpu.memory_space<vmem>>, vector<1x1x64xf32>
    %24 = vector.shape_cast %23 : vector<1x1x64xf32> to vector<1x64xf32>
    %25 = vector.broadcast %24 : vector<1x64xf32> to vector<8x64xf32>
    %26 = arith.addf %22, %25 : vector<8x64xf32>
    %c1_21 = arith.constant 1 : index
    %c0_22 = arith.constant 0 : index
    %c0_23 = arith.constant 0 : index
    %27 = vector.load %arg8[%c1_21, %c0_22, %c0_23] : memref<3x8x64xf32, #tpu.memory_space<vmem>>, vector<1x8x64xf32>
    %28 = vector.shape_cast %27 : vector<1x8x64xf32> to vector<8x64xf32>
    %29 = vector.shape_cast %26 : vector<8x64xf32> to vector<1x8x64xf32>
    tpu.vector_store %arg8[%c1_21, %c0_22, %c0_23], %29 {strides = array<i32>} : memref<3x8x64xf32, #tpu.memory_space<vmem>>, vector<1x8x64xf32>,
    %c2 = arith.constant 2 : index
    %c0_24 = arith.constant 0 : index
    %c0_25 = arith.constant 0 : index
    %30 = vector.load %arg3[%c2, %c0_24, %c0_25] : memref<3x32x64xf32, #tpu.memory_space<vmem>>, vector<1x32x64xf32>
    %31 = vector.shape_cast %30 : vector<1x32x64xf32> to vector<32x64xf32>
    %cst_26 = arith.constant dense<0.000000e+00> : vector<8x64xf32>
    %32 = tpu.matmul %7, %31, %cst_26 {dimension_numbers = #tpu.dot_dimension_numbers<[1], [0], [0], [1], [0, 0, 1, 1], [], []>} : vector<8x32xf32>, vector<32x64xf32>, vector<8x64xf32> -> vector<8x64xf32>
    %c2_27 = arith.constant 2 : index
    %c0_28 = arith.constant 0 : index
    %c0_29 = arith.constant 0 : index
    %33 = vector.load %arg4[%c2_27, %c0_28, %c0_29] : memref<3x1x64xf32, #tpu.memory_space<vmem>>, vector<1x1x64xf32>
    %34 = vector.shape_cast %33 : vector<1x1x64xf32> to vector<1x64xf32>
    %35 = vector.broadcast %34 : vector<1x64xf32> to vector<8x64xf32>
    %36 = arith.addf %32, %35 : vector<8x64xf32>
    %c2_30 = arith.constant 2 : index
    %c0_31 = arith.constant 0 : index
    %c0_32 = arith.constant 0 : index
    %37 = vector.load %arg8[%c2_30, %c0_31, %c0_32] : memref<3x8x64xf32, #tpu.memory_space<vmem>>, vector<1x8x64xf32>
    %38 = vector.shape_cast %37 : vector<1x8x64xf32> to vector<8x64xf32>
    %39 = vector.shape_cast %36 : vector<8x64xf32> to vector<1x8x64xf32>
    tpu.vector_store %arg8[%c2_30, %c0_31, %c0_32], %39 {strides = array<i32>} : memref<3x8x64xf32, #tpu.memory_space<vmem>>, vector<1x8x64xf32>,
    %40 = vector.broadcast %5 : vector<1x32xf32> to vector<8x32xf32>
    %41 = arith.addf %6, %40 : vector<8x32xf32>
    %42 = math.cos %41 : vector<8x32xf32>
    %cst_33 = arith.constant 1.000000e+00 : f32
    %43 = vector.broadcast %cst_33 : f32 to vector<8x32xf32>
    %44 = arith.mulf %43, %42 : vector<8x32xf32>
    %c0_34 = arith.constant 0 : index
    %c0_35 = arith.constant 0 : index
    %45 = vector.load %arg7[%c0_34, %c0_35] : memref<8x384xf32, #tpu.memory_space<vmem>>, vector<8x32xf32>
    tpu.vector_store %arg7[%c0_34, %c0_35], %44 {strides = array<i32>} : memref<8x384xf32, #tpu.memory_space<vmem>>, vector<8x32xf32>,
    %46 = arith.truncf %44 : vector<8x32xf32> to vector<8x32xbf16>
    %c0_36 = arith.constant 0 : index
    %c0_37 = arith.constant 0 : index
    %c0_38 = arith.constant 0 : index
    %47 = vector.load %arg2[%c0_36, %c0_37, %c0_38] : memref<3x32x64xbf16, #tpu.memory_space<vmem>>, vector<1x32x64xbf16>
    %48 = vector.shape_cast %47 : vector<1x32x64xbf16> to vector<32x64xbf16>
    %cst_39 = arith.constant dense<0.000000e+00> : vector<8x64xf32>
    %49 = tpu.matmul %46, %48, %cst_39 {dimension_numbers = #tpu.dot_dimension_numbers<[1], [0], [0], [1], [0, 0, 1, 1], [], []>} : vector<8x32xbf16>, vector<32x64xbf16>, vector<8x64xf32> -> vector<8x64xf32>
    %c0_40 = arith.constant 0 : index
    %c0_41 = arith.constant 0 : index
    %c0_42 = arith.constant 0 : index
    %50 = vector.load %arg8[%c0_40, %c0_41, %c0_42] : memref<3x8x64xf32, #tpu.memory_space<vmem>>, vector<1x8x64xf32>
    %51 = vector.shape_cast %50 : vector<1x8x64xf32> to vector<8x64xf32>
    %52 = arith.addf %49, %51 : vector<8x64xf32>
    %cst_43 = arith.constant 0.000000e+00 : f32
    %53 = vector.broadcast %cst_43 : f32 to vector<8x64xf32>
    %54 = arith.maximumf %52, %53 : vector<8x64xf32>
    %55 = arith.truncf %54 : vector<8x64xf32> to vector<8x64xbf16>
    %c0_44 = arith.constant 0 : index
    %c0_45 = arith.constant 0 : index
    %c0_46 = arith.constant 0 : index
    %56 = vector.load %arg5[%c0_44, %c0_45, %c0_46] : memref<3x64x64xbf16, #tpu.memory_space<vmem>>, vector<1x64x64xbf16>
    %57 = vector.shape_cast %56 : vector<1x64x64xbf16> to vector<64x64xbf16>
    %cst_47 = arith.constant dense<0.000000e+00> : vector<8x64xf32>
    %58 = tpu.matmul %55, %57, %cst_47 {dimension_numbers = #tpu.dot_dimension_numbers<[1], [0], [0], [1], [0, 0, 1, 1], [], []>} : vector<8x64xbf16>, vector<64x64xbf16>, vector<8x64xf32> -> vector<8x64xf32>
    %c0_48 = arith.constant 0 : index
    %c0_49 = arith.constant 0 : index
    %c0_50 = arith.constant 0 : index
    %59 = vector.load %arg6[%c0_48, %c0_49, %c0_50] : memref<3x1x64xf32, #tpu.memory_space<vmem>>, vector<1x1x64xf32>
    %60 = vector.shape_cast %59 : vector<1x1x64xf32> to vector<1x64xf32>
    %61 = vector.broadcast %60 : vector<1x64xf32> to vector<8x64xf32>
    %62 = arith.addf %58, %61 : vector<8x64xf32>
    %c0_51 = arith.constant 0 : index
    %c128 = arith.constant 128 : index
    %63 = vector.load %arg7[%c0_51, %c128] : memref<8x384xf32, #tpu.memory_space<vmem>>, vector<8x64xf32>
    tpu.vector_store %arg7[%c0_51, %c128], %62 {strides = array<i32>} : memref<8x384xf32, #tpu.memory_space<vmem>>, vector<8x64xf32>,
    %64 = vector.extract_strided_slice %62 {offsets = [0, 0], sizes = [8, 32], strides = [1, 1]} : vector<8x64xf32> to vector<8x32xf32>
    %65 = vector.extract_strided_slice %62 {offsets = [0, 32], sizes = [8, 32], strides = [1, 1]} : vector<8x64xf32> to vector<8x32xf32>
    %66 = arith.negf %65 : vector<8x32xf32>
    %67 = math.exp %66 : vector<8x32xf32>
    %cst_52 = arith.constant 1.000000e+00 : f32
    %68 = vector.broadcast %cst_52 : f32 to vector<8x32xf32>
    %69 = arith.addf %68, %67 : vector<8x32xf32>
    %70 = arith.divf %68, %69 : vector<8x32xf32>
    %71 = arith.mulf %70, %64 : vector<8x32xf32>
    %72 = arith.subf %6, %71 : vector<8x32xf32>
    %73 = vector.broadcast %5 : vector<1x32xf32> to vector<8x32xf32>
    %74 = arith.addf %72, %73 : vector<8x32xf32>
    %75 = math.cos %74 : vector<8x32xf32>
    %cst_53 = arith.constant 1.000000e+00 : f32
    %76 = vector.broadcast %cst_53 : f32 to vector<8x32xf32>
    %77 = arith.mulf %76, %75 : vector<8x32xf32>
    %c0_54 = arith.constant 0 : index
    %c32_55 = arith.constant 32 : index
    %78 = vector.load %arg7[%c0_54, %c32_55] : memref<8x384xf32, #tpu.memory_space<vmem>>, vector<8x32xf32>
    tpu.vector_store %arg7[%c0_54, %c32_55], %77 {strides = array<i32>} : memref<8x384xf32, #tpu.memory_space<vmem>>, vector<8x32xf32>,
    %79 = arith.truncf %77 : vector<8x32xf32> to vector<8x32xbf16>
    %c1_56 = arith.constant 1 : index
    %c0_57 = arith.constant 0 : index
    %c0_58 = arith.constant 0 : index
    %80 = vector.load %arg2[%c1_56, %c0_57, %c0_58] : memref<3x32x64xbf16, #tpu.memory_space<vmem>>, vector<1x32x64xbf16>
    %81 = vector.shape_cast %80 : vector<1x32x64xbf16> to vector<32x64xbf16>
    %cst_59 = arith.constant dense<0.000000e+00> : vector<8x64xf32>
    %82 = tpu.matmul %79, %81, %cst_59 {dimension_numbers = #tpu.dot_dimension_numbers<[1], [0], [0], [1], [0, 0, 1, 1], [], []>} : vector<8x32xbf16>, vector<32x64xbf16>, vector<8x64xf32> -> vector<8x64xf32>
    %c1_60 = arith.constant 1 : index
    %c0_61 = arith.constant 0 : index
    %c0_62 = arith.constant 0 : index
    %83 = vector.load %arg8[%c1_60, %c0_61, %c0_62] : memref<3x8x64xf32, #tpu.memory_space<vmem>>, vector<1x8x64xf32>
    %84 = vector.shape_cast %83 : vector<1x8x64xf32> to vector<8x64xf32>
    %85 = arith.addf %82, %84 : vector<8x64xf32>
    %cst_63 = arith.constant 0.000000e+00 : f32
    %86 = vector.broadcast %cst_63 : f32 to vector<8x64xf32>
    %87 = arith.maximumf %85, %86 : vector<8x64xf32>
    %88 = arith.truncf %87 : vector<8x64xf32> to vector<8x64xbf16>
    %c1_64 = arith.constant 1 : index
    %c0_65 = arith.constant 0 : index
    %c0_66 = arith.constant 0 : index
    %89 = vector.load %arg5[%c1_64, %c0_65, %c0_66] : memref<3x64x64xbf16, #tpu.memory_space<vmem>>, vector<1x64x64xbf16>
    %90 = vector.shape_cast %89 : vector<1x64x64xbf16> to vector<64x64xbf16>
    %cst_67 = arith.constant dense<0.000000e+00> : vector<8x64xf32>
    %91 = tpu.matmul %88, %90, %cst_67 {dimension_numbers = #tpu.dot_dimension_numbers<[1], [0], [0], [1], [0, 0, 1, 1], [], []>} : vector<8x64xbf16>, vector<64x64xbf16>, vector<8x64xf32> -> vector<8x64xf32>
    %c1_68 = arith.constant 1 : index
    %c0_69 = arith.constant 0 : index
    %c0_70 = arith.constant 0 : index
    %92 = vector.load %arg6[%c1_68, %c0_69, %c0_70] : memref<3x1x64xf32, #tpu.memory_space<vmem>>, vector<1x1x64xf32>
    %93 = vector.shape_cast %92 : vector<1x1x64xf32> to vector<1x64xf32>
    %94 = vector.broadcast %93 : vector<1x64xf32> to vector<8x64xf32>
    %95 = arith.addf %91, %94 : vector<8x64xf32>
    %c0_71 = arith.constant 0 : index
    %c192 = arith.constant 192 : index
    %96 = vector.load %arg7[%c0_71, %c192] : memref<8x384xf32, #tpu.memory_space<vmem>>, vector<8x64xf32>
    tpu.vector_store %arg7[%c0_71, %c192], %95 {strides = array<i32>} : memref<8x384xf32, #tpu.memory_space<vmem>>, vector<8x64xf32>,
    %97 = vector.extract_strided_slice %95 {offsets = [0, 0], sizes = [8, 32], strides = [1, 1]} : vector<8x64xf32> to vector<8x32xf32>
    %98 = vector.extract_strided_slice %95 {offsets = [0, 32], sizes = [8, 32], strides = [1, 1]} : vector<8x64xf32> to vector<8x32xf32>
    %99 = arith.negf %98 : vector<8x32xf32>
    %100 = math.exp %99 : vector<8x32xf32>
    %cst_72 = arith.constant 1.000000e+00 : f32
    %101 = vector.broadcast %cst_72 : f32 to vector<8x32xf32>
    %102 = arith.addf %101, %100 : vector<8x32xf32>
    %103 = arith.divf %101, %102 : vector<8x32xf32>
    %104 = arith.mulf %103, %97 : vector<8x32xf32>
    %105 = arith.subf %72, %104 : vector<8x32xf32>
    %106 = vector.broadcast %5 : vector<1x32xf32> to vector<8x32xf32>
    %107 = arith.addf %105, %106 : vector<8x32xf32>
    %108 = math.cos %107 : vector<8x32xf32>
    %cst_73 = arith.constant 1.000000e+00 : f32
    %109 = vector.broadcast %cst_73 : f32 to vector<8x32xf32>
    %110 = arith.mulf %109, %108 : vector<8x32xf32>
    %c0_74 = arith.constant 0 : index
    %c64 = arith.constant 64 : index
    %111 = vector.load %arg7[%c0_74, %c64] : memref<8x384xf32, #tpu.memory_space<vmem>>, vector<8x32xf32>
    tpu.vector_store %arg7[%c0_74, %c64], %110 {strides = array<i32>} : memref<8x384xf32, #tpu.memory_space<vmem>>, vector<8x32xf32>,
    %112 = arith.truncf %110 : vector<8x32xf32> to vector<8x32xbf16>
    %c2_75 = arith.constant 2 : index
    %c0_76 = arith.constant 0 : index
    %c0_77 = arith.constant 0 : index
    %113 = vector.load %arg2[%c2_75, %c0_76, %c0_77] : memref<3x32x64xbf16, #tpu.memory_space<vmem>>, vector<1x32x64xbf16>
    %114 = vector.shape_cast %113 : vector<1x32x64xbf16> to vector<32x64xbf16>
    %cst_78 = arith.constant dense<0.000000e+00> : vector<8x64xf32>
    %115 = tpu.matmul %112, %114, %cst_78 {dimension_numbers = #tpu.dot_dimension_numbers<[1], [0], [0], [1], [0, 0, 1, 1], [], []>} : vector<8x32xbf16>, vector<32x64xbf16>, vector<8x64xf32> -> vector<8x64xf32>
    %c2_79 = arith.constant 2 : index
    %c0_80 = arith.constant 0 : index
    %c0_81 = arith.constant 0 : index
    %116 = vector.load %arg8[%c2_79, %c0_80, %c0_81] : memref<3x8x64xf32, #tpu.memory_space<vmem>>, vector<1x8x64xf32>
    %117 = vector.shape_cast %116 : vector<1x8x64xf32> to vector<8x64xf32>
    %118 = arith.addf %115, %117 : vector<8x64xf32>
    %cst_82 = arith.constant 0.000000e+00 : f32
    %119 = vector.broadcast %cst_82 : f32 to vector<8x64xf32>
    %120 = arith.maximumf %118, %119 : vector<8x64xf32>
    %121 = arith.truncf %120 : vector<8x64xf32> to vector<8x64xbf16>
    %c2_83 = arith.constant 2 : index
    %c0_84 = arith.constant 0 : index
    %c0_85 = arith.constant 0 : index
    %122 = vector.load %arg5[%c2_83, %c0_84, %c0_85] : memref<3x64x64xbf16, #tpu.memory_space<vmem>>, vector<1x64x64xbf16>
    %123 = vector.shape_cast %122 : vector<1x64x64xbf16> to vector<64x64xbf16>
    %cst_86 = arith.constant dense<0.000000e+00> : vector<8x64xf32>
    %124 = tpu.matmul %121, %123, %cst_86 {dimension_numbers = #tpu.dot_dimension_numbers<[1], [0], [0], [1], [0, 0, 1, 1], [], []>} : vector<8x64xbf16>, vector<64x64xbf16>, vector<8x64xf32> -> vector<8x64xf32>
    %c2_87 = arith.constant 2 : index
    %c0_88 = arith.constant 0 : index
    %c0_89 = arith.constant 0 : index
    %125 = vector.load %arg6[%c2_87, %c0_88, %c0_89] : memref<3x1x64xf32, #tpu.memory_space<vmem>>, vector<1x1x64xf32>
    %126 = vector.shape_cast %125 : vector<1x1x64xf32> to vector<1x64xf32>
    %127 = vector.broadcast %126 : vector<1x64xf32> to vector<8x64xf32>
    %128 = arith.addf %124, %127 : vector<8x64xf32>
    %c0_90 = arith.constant 0 : index
    %c256 = arith.constant 256 : index
    %129 = vector.load %arg7[%c0_90, %c256] : memref<8x384xf32, #tpu.memory_space<vmem>>, vector<8x64xf32>
    tpu.vector_store %arg7[%c0_90, %c256], %128 {strides = array<i32>} : memref<8x384xf32, #tpu.memory_space<vmem>>, vector<8x64xf32>,
    %130 = vector.extract_strided_slice %128 {offsets = [0, 0], sizes = [8, 32], strides = [1, 1]} : vector<8x64xf32> to vector<8x32xf32>
    %131 = vector.extract_strided_slice %128 {offsets = [0, 32], sizes = [8, 32], strides = [1, 1]} : vector<8x64xf32> to vector<8x32xf32>
    %132 = arith.negf %131 : vector<8x32xf32>
    %133 = math.exp %132 : vector<8x32xf32>
    %cst_91 = arith.constant 1.000000e+00 : f32
    %134 = vector.broadcast %cst_91 : f32 to vector<8x32xf32>
    %135 = arith.addf %134, %133 : vector<8x32xf32>
    %136 = arith.divf %134, %135 : vector<8x32xf32>
    %137 = arith.mulf %136, %130 : vector<8x32xf32>
    %138 = arith.subf %105, %137 : vector<8x32xf32>
    %139 = vector.broadcast %5 : vector<1x32xf32> to vector<8x32xf32>
    %140 = arith.addf %138, %139 : vector<8x32xf32>
    %141 = math.cos %140 : vector<8x32xf32>
    %cst_92 = arith.constant 1.000000e+00 : f32
    %142 = vector.broadcast %cst_92 : f32 to vector<8x32xf32>
    %143 = arith.mulf %142, %141 : vector<8x32xf32>
    %c0_93 = arith.constant 0 : index
    %c96 = arith.constant 96 : index
    %144 = vector.load %arg7[%c0_93, %c96] : memref<8x384xf32, #tpu.memory_space<vmem>>, vector<8x32xf32>
    tpu.vector_store %arg7[%c0_93, %c96], %143 {strides = array<i32>} : memref<8x384xf32, #tpu.memory_space<vmem>>, vector<8x32xf32>,
    return
  }
  func.func @transform_0(%arg0: i32) -> (i32, i32) {
    %c0_i32 = arith.constant 0 : i32
    %c0_i32_0 = arith.constant 0 : i32
    return %arg0, %c0_i32 : i32, i32
  }
  func.func @transform_1(%arg0: i32) -> (i32, i32, i32) {
    %c0_i32 = arith.constant 0 : i32
    %c0_i32_0 = arith.constant 0 : i32
    %c0_i32_1 = arith.constant 0 : i32
    %c0_i32_2 = arith.constant 0 : i32
    return %c0_i32, %c0_i32_0, %c0_i32_1 : i32, i32, i32
  }
  func.func @transform_2(%arg0: i32) -> (i32, i32, i32) {
    %c0_i32 = arith.constant 0 : i32
    %c0_i32_0 = arith.constant 0 : i32
    %c0_i32_1 = arith.constant 0 : i32
    %c0_i32_2 = arith.constant 0 : i32
    return %c0_i32, %c0_i32_0, %c0_i32_1 : i32, i32, i32
  }
  func.func @transform_3(%arg0: i32) -> (i32, i32, i32) {
    %c0_i32 = arith.constant 0 : i32
    %c0_i32_0 = arith.constant 0 : i32
    %c0_i32_1 = arith.constant 0 : i32
    %c0_i32_2 = arith.constant 0 : i32
    return %c0_i32, %c0_i32_0, %c0_i32_1 : i32, i32, i32
  }
  func.func @transform_4(%arg0: i32) -> (i32, i32, i32) {
    %c0_i32 = arith.constant 0 : i32
    %c0_i32_0 = arith.constant 0 : i32
    %c0_i32_1 = arith.constant 0 : i32
    %c0_i32_2 = arith.constant 0 : i32
    return %c0_i32, %c0_i32_0, %c0_i32_1 : i32, i32, i32
  }
  func.func @transform_5(%arg0: i32) -> (i32, i32, i32) {
    %c0_i32 = arith.constant 0 : i32
    %c0_i32_0 = arith.constant 0 : i32
    %c0_i32_1 = arith.constant 0 : i32
    %c0_i32_2 = arith.constant 0 : i32
    return %c0_i32, %c0_i32_0, %c0_i32_1 : i32, i32, i32
  }
  func.func @transform_6(%arg0: i32) -> (i32, i32) {
    %c0_i32 = arith.constant 0 : i32
    %c0_i32_0 = arith.constant 0 : i32
    return %arg0, %c0_i32 : i32, i32
  }
}

</mosaic_0001>

<bundles_post_ra>
// kernel: tpu_custom_call.1
= control target key start
LH: loop header
LB: loop body
LE: loop exit
PB: predicated region body
PF: predicated region fallthrough
CT: control target
= control target key end

     0   :  { %11 = vsyncpa [#allocation4], 0  ;;  %s2071_s0 = inlined_call_operand.hbm [shape: f32[8,64], index: 0, kind: input, shape index: {}]   ;;  %s2072_s1 = inlined_call_operand.hbm [shape: bf16[3,32,64], index: 1, kind: input, shape index: {}]   ;;  %s2073_s2 = inlined_call_operand.hbm [shape: f32[3,32,64], index: 2, kind: input, shape index: {}]   ;;  %s2074_s3 = inlined_call_operand.vmem [shape: f32[3,1,64], index: 3, kind: input, shape index: {}]   ;;  %s2075_s4 = inlined_call_operand.hbm [shape: bf16[3,64,64], index: 4, kind: input, shape index: {}]   ;;  %s2076_s5 = inlined_call_operand.vmem [shape: f32[3,1,64], index: 5, kind: input, shape index: {}]   ;;  %s2077_s6 = inlined_call_operand.hbm [shape: f32[8,384], index: 6, kind: output, shape index: {}]  }
   0x1   :  { %12 = vsyncpa [#allocation7], 0 }
   0x2   :  { %13 = vsyncpa [#allocation10], 0 }
   0x3   :  { %14 = vsyncpa [#allocation5], 0  ;;  %s1697_s21 = smov [#allocation6]   ;;  %s1579_s25 = scalar_lea.hbm %s2072_s1, 768 }
   0x4   :  { %s30_s22 = sshll.u32 %s1697_s21, 4  ;;  %p1580_p0 = scmp.ne.s32.totalorder %s2072_s1, %s1579_s25  ;;  %s31_s22 = int_to_ptr.vmem [resolvable:$true] %s30_s22 }
   0x5   :  { %p1583_p1 = scmp.lt.u32.totalorder %s1579_s25, %s2072_s1 }
   0x7   :  { %p1585_p2 = pnand %p1583_p1, %p1580_p0 }
   0x9   :  { %1588 = shalt.err (!%p1585_p2)
}
   0xa   :  { %s1589_s30 = scalar_lea.vmem %s31_s22, 768  ;;  %p1594_p4 = scmp.lt.s32.totalorder %s31_s22, %s31_s22 }
   0xb   :  { %p1590_p3 = scmp.ne.s32.totalorder %s31_s22, %s1589_s30  ;;  %p1595_p5 = scmp.lt.s32.totalorder %s1589_s30, %s1589_s30 }
   0xd   :  { %p1596_p6 = por %p1595_p5, %p1594_p4 }
   0xf   :  { %p1597_p7 = pnand %p1596_p6, %p1590_p3 }
  0x11   :  { %1600 = shalt.err (!%p1597_p7)
}
  0x12   :  { %s1698_s7 = smov 64   ;;  %s1699_s8 = smov 4  }
  0x13   :  { %36 = dma.hbm_to_vmem [thread:$0]  %s2072_s1, 768, %s31_s22, [#allocation7], %s1698_s7, %s1698_s7, %s1699_s8  }
  0x14   :  { %s1700_s11 = smov [#allocation3]   ;;  %s1701_s13 = smov [#allocation8]  }
  0x15   :  { %s21_s12 = sshll.u32 %s1700_s11, 4  ;;  %s42_s14 = sshll.u32 %s1701_s13, 4  ;;  %s22_s12 = int_to_ptr.vmem [resolvable:$true] %s21_s12  ;;  %s43_s14 = int_to_ptr.vmem [resolvable:$true] %s42_s14 }
  0x16   :  { %s1601_s17 = scalar_lea.hbm %s2071_s0, 128 }
  0x17   :  { %p1602_p8 = scmp.ne.s32.totalorder %s2071_s0, %s1601_s17  ;;  %p1605_p9 = scmp.lt.u32.totalorder %s1601_s17, %s2071_s0 }
  0x19   :  { %p1607_p10 = pnand %p1605_p9, %p1602_p8 }
  0x1b   :  { %1610 = shalt.err (!%p1607_p10)
}
  0x1c   :  { %s1611_s1 = scalar_lea.vmem %s22_s12, 128  ;;  %p1616_p12 = scmp.lt.s32.totalorder %s22_s12, %s22_s12 }
  0x1d   :  { %p1612_p11 = scmp.ne.s32.totalorder %s22_s12, %s1611_s1  ;;  %p1617_p13 = scmp.lt.s32.totalorder %s1611_s1, %s1611_s1 }
  0x1f   :  { %p1618_p0 = por %p1617_p13, %p1616_p12 }
  0x21   :  { %p1619_p1 = pnand %p1618_p0, %p1612_p11 }
  0x23   :  { %1622 = shalt.err (!%p1619_p1)
}
  0x24   :  { %24 = dma.hbm_to_vmem [thread:$0]  %s2071_s0, 128, %s22_s12, [#allocation4]  }
  0x25   :  { %s1623_s26 = scalar_lea.hbm %s2073_s2, 1536 }
  0x26   :  { %p1624_p2 = scmp.ne.s32.totalorder %s2073_s2, %s1623_s26  ;;  %p1627_p3 = scmp.lt.u32.totalorder %s1623_s26, %s2073_s2 }
  0x28   :  { %p1629_p4 = pnand %p1627_p3, %p1624_p2 }
  0x2a   :  { %1632 = shalt.err (!%p1629_p4)
}
  0x2b   :  { %s1633_s9 = scalar_lea.vmem %s43_s14, 1536  ;;  %p1638_p6 = scmp.lt.s32.totalorder %s43_s14, %s43_s14 }
  0x2c   :  { %p1634_p5 = scmp.ne.s32.totalorder %s43_s14, %s1633_s9  ;;  %p1639_p7 = scmp.lt.s32.totalorder %s1633_s9, %s1633_s9 }
  0x2e   :  { %p1640_p8 = por %p1639_p7, %p1638_p6 }
  0x30   :  { %p1641_p9 = pnand %p1640_p8, %p1634_p5 }
  0x32   :  { %1644 = shalt.err (!%p1641_p9)
}
  0x33   :  { %s1702_s0 = smov 128   ;;  %s1703_s10 = smov 8  }
  0x34   :  { %48 = dma.hbm_to_vmem [thread:$0]  %s2073_s2, 1536, %s43_s14, [#allocation7], %s1702_s0, %s1702_s0, %s1703_s10  }
  0x35   :  { %s1704_s13 = smov [#allocation9]   ;;  %s1645_s18 = scalar_lea.hbm %s2075_s4, 1536 }
  0x36   :  { %s56_s15 = sshll.u32 %s1704_s13, 4  ;;  %p1646_p10 = scmp.ne.s32.totalorder %s2075_s4, %s1645_s18  ;;  %s57_s15 = int_to_ptr.vmem [resolvable:$true] %s56_s15 }
  0x37   :  { %p1649_p11 = scmp.lt.u32.totalorder %s1645_s18, %s2075_s4 }
  0x39   :  { %p1651_p12 = pnand %p1649_p11, %p1646_p10 }
  0x3b   :  { %1654 = shalt.err (!%p1651_p12)
}
  0x3c   :  { %s1655_s22 = scalar_lea.vmem %s57_s15, 1536  ;;  %p1660_p0 = scmp.lt.s32.totalorder %s57_s15, %s57_s15 }
  0x3d   :  { %p1656_p13 = scmp.ne.s32.totalorder %s57_s15, %s1655_s22  ;;  %p1661_p1 = scmp.lt.s32.totalorder %s1655_s22, %s1655_s22 }
  0x3f   :  { %p1662_p2 = por %p1661_p1, %p1660_p0 }
  0x41   :  { %p1663_p3 = pnand %p1662_p2, %p1656_p13 }
  0x43   :  { %1666 = shalt.err (!%p1663_p3)
}
  0x44   :  { %62 = dma.hbm_to_vmem [thread:$0]  %s2075_s4, 1536, %s57_s15, [#allocation10], %s1698_s7, %s1698_s7, %s1699_s8  }
  0x45   :  { %1689 = dma.done.wait [#allocation4], 128  }
  0x46   :  { %1690 = vsyncadd [#allocation4], 4294967168 }
  0x47   :  { %1691 = dma.done.wait [#allocation7], 2304  }
  0x48   :  { %1692 = vsyncadd [#allocation7], 4294964992 }
  0x49   :  { %1693 = dma.done.wait [#allocation10], 1536  }
  0x4a   :  { %1694 = vsyncadd [#allocation10], 4294965760  ;;  %v78_v0 = vlaneseq  ;;  %v1705_v2 = vmov 0.0|0.0   ;;  %vm1706_vm1 = vmmov 0   ;;  %v1707_v3 = vmov 0.0   ;;  %v1815_v5 = vld [vmem:[#allocation3] sm:$0xff] }
  0x4b   :  { %1479 = vmatprep.subr.bf16.mxu1 %v1705_v2  ;;  %1491 = vmatprep.subr.bf16.mxu0 %v1705_v2  ;;  %v85_v6 = vld [vmem:[#allocation8] sm:$0xff]  ;;  %v86_v7 = vld [vmem:[#allocation8 + $0x8] sm:$0xff]  ;;  %s1708_s4 = smov 96   ;;  %v87_v12 = vld [vmem:[#allocation8 + $0x10] sm:$0xff]  ;;  %v1709_v31 = vmov 683565275  }
  0x4c   :  { %v79_v1 = vand.u32 127, %v78_v0  ;;  %1394 = vmatprep.mubr.msk.f32.mxu1 %vm1706_vm1, %v1707_v3  ;;  %1416 = vmatprep.mubr.msk.f32.mxu0 %vm1706_vm1, %v1707_v3  ;;  %v1480_v9 = vpack.c.bf16 %v86_v7, %v85_v6  ;;  %v260_v10 = vld [vmem:[#allocation8 + $0x40] sm:$0xff]  ;;  %v261_v11 = vld [vmem:[#allocation8 + $0x48] sm:$0xff]  ;;  %v88_v14 = vld [vmem:[#allocation8 + $0x18] sm:$0xff]  ;;  %v1710_v33 = vmov 2475754826  }
  0x4d   :  { %97 = vrot.lane.b32.xlu0 %v1815_v5, %s1708_s4  ;;  %v1492_v13 = vpack.c.bf16 %v261_v11, %v260_v10  ;;  %v262_v15 = vld [vmem:[#allocation8 + $0x50] sm:$0xff]  ;;  %v263_v16 = vld [vmem:[#allocation8 + $0x58] sm:$0xff]  ;;  %v1483_v19 = vpack.c.bf16 %v88_v14, %v87_v12  ;;  %v1711_v35 = vmov 2131351028   ;;  %v1712_v37 = vmov 2102212464  }
  0x4e   :  { %vm80_vm0 = vcmp.ge.s32.totalorder %v79_v1, 16  ;;  %1481 = vmatpush3.bf16.msra.mxu1 %v1480_v9  ;;  %v1495_v20 = vpack.c.bf16 %v263_v16, %v262_v15  ;;  %v1713_v39 = vmov 920167782   ;;  %v1714_v46 = vmov 1326507024   ;;  %s1715_s29 = smov 32  }
  0x4f   :  { %v1813_v4 = vsel %vm80_vm0, -1.5707964, %v1707_v3  ;;  %1493 = vmatpush3.bf16.msra.mxu0 %v1492_v13  ;;  %1482 = vmatprep.subr.bf16.mxu1 %v1705_v2  ;;  %vm99_vm15 = vcmask 261120   ;;  %vm172_vm0 = vcmask 523264  }
  0x50   :  { %v1821_v8 = vadd.f32 %v1815_v5, %v1813_v4  ;;  %1494 = vmatprep.subr.bf16.mxu0 %v1705_v2 }
  0x52   :  { %v345_v17 = vand.u32 2147483647, %v1821_v8  ;;  %v348_v18 = vand.u32 2139095040, %v1821_v8  ;;  %1484 = vmatpush3.bf16.msra.mxu1 %v1483_v19  ;;  %vm347_vm9 = vcmp.lt.s32.totalorder %v1821_v8, 0  ;;  %vm437_vm14 = vweird.f32 %v1821_v8 }
  0x53   :  { %1496 = vmatpush3.bf16.msra.mxu0 %v1495_v20  ;;  %1485 = vmatprep.subr.bf16.mxu1 %v1705_v2 }
  0x54   :  { %v349_v21 = vshrl.u32 %v348_v18, 23  ;;  %v352_v22 = vand.u32 8388607, %v345_v17  ;;  %1427 = vmatprep.subr.bf16.mxu0 %v1707_v3  ;;  %vm346_vm10 = vcmp.le.f32.partialorder %v345_v17, 0.7853982 }
  0x56   :  { %v1299_v23 = vadd.s32 4294967169, %v349_v21  ;;  %v353_v24 = vor.u32 8388608, %v352_v22 }
  0x58   :  { %v355_v25 = vadd.s32 1, %v1299_v23  ;;  %v393_v27 = vshll.u32 %v353_v24, 8 }
  0x5a   :  { %vm356_vm2 = vcmp.gt.s32.totalorder %v355_v25, 0 }
  0x5b   :  { %v357_v26 = vsel %vm356_vm2, %v355_v25, 0 }
  0x5c   :  { %v358_v28 = vshrl.u32 %v357_v26, 5  ;;  %v359_v29 = vand.u32 31, %v357_v26 }
  0x5e   :  { %v360_v30 = vsub.s32 32, %v359_v29  ;;  %v362_v32 = vshll.u32 %v1709_v31, %v359_v29  ;;  %v365_v34 = vshll.u32 %v1710_v33, %v359_v29  ;;  %v368_v36 = vshll.u32 %v1711_v35, %v359_v29 }
  0x5f   :  { %v371_v38 = vshll.u32 %v1712_v37, %v359_v29  ;;  %v374_v40 = vshll.u32 %v1713_v39, %v359_v29  ;;  %vm377_vm3 = vcmp.lt.s32.totalorder %v358_v28, 1  ;;  %vm378_vm4 = vcmp.lt.s32.totalorder %v358_v28, 2 }
  0x60   :  { %v361_v41 = vshrl.u32 %v1709_v31, %v360_v30  ;;  %v363_v42 = vshrl.u32 %v1710_v33, %v360_v30  ;;  %v366_v43 = vshrl.u32 %v1711_v35, %v360_v30  ;;  %v369_v44 = vshrl.u32 %v1712_v37, %v360_v30 }
  0x61   :  { %v372_v45 = vshrl.u32 %v1713_v39, %v360_v30  ;;  %v375_v47 = vshrl.u32 %v1714_v46, %v360_v30  ;;  %vm379_vm5 = vcmp.lt.s32.totalorder %v358_v28, 3  ;;  %vm380_vm6 = vcmp.lt.s32.totalorder %v358_v28, 4 }
  0x62   :  { %v364_v48 = vor.u32 %v363_v42, %v362_v32  ;;  %v367_v49 = vor.u32 %v366_v43, %v365_v34  ;;  %v370_v50 = vor.u32 %v369_v44, %v368_v36 }
  0x63   :  { %v373_v51 = vor.u32 %v372_v45, %v371_v38  ;;  %v376_v52 = vor.u32 %v375_v47, %v374_v40 }
  0x64   :  { %v381_v53 = vsel %vm377_vm3, %v361_v41, %v364_v48  ;;  %v382_v54 = vsel %vm380_vm6, %v370_v50, 2102212464  ;;  %v385_v55 = vsel %vm377_vm3, %v364_v48, %v367_v49  ;;  %v389_v56 = vsel %vm377_vm3, %v367_v49, %v370_v50 }
  0x65   :  { %v383_v57 = vsel %vm379_vm5, %v367_v49, %v382_v54  ;;  %v386_v58 = vsel %vm380_vm6, %v373_v51, 920167782  ;;  %v390_v59 = vsel %vm380_vm6, %v376_v52, 1326507024 }
  0x66   :  { %v387_v60 = vsel %vm379_vm5, %v370_v50, %v386_v58  ;;  %v391_v61 = vsel %vm379_vm5, %v373_v51, %v390_v59  ;;  %v384_v62 = vsel %vm378_vm4, %v381_v53, %v383_v57  ;;  %v176_v57 = vld [vmem:[#allocation8 + $0x28] sm:$0xff]  ;;  %v177_v59 = vld [vmem:[#allocation8 + $0x30] sm:$0xff] }
  0x67   :  { %v388_v63 = vsel %vm378_vm4, %v385_v55, %v387_v60  ;;  %v392_v0 = vsel %vm378_vm4, %v389_v56, %v391_v61  ;;  %v400_v10 = vmul.u32 %v393_v27, %v384_v62  ;;  %v175_v56 = vld [vmem:[#allocation8 + $0x20] sm:$0xff]  ;;  %v178_v60 = vld [vmem:[#allocation8 + $0x38] sm:$0xff] }
  0x68   :  { %v1848_v1 = vmul.u32.u64.low %v393_v27, %v392_v0  ;;  %v1849_v6 = vmul.u32.u64.high %v393_v27, %v392_v0, %v1848_v1  ;;  %v1851_v7 = vmul.u32.u64.low %v393_v27, %v388_v63  ;;  %v1852_v9 = vmul.u32.u64.high %v393_v27, %v388_v63, %v1851_v7  ;;  %v1534_v63 = vld [vmem:[#allocation6 + $0x8] sm:$0xff]  }
  0x69   :  { %v1486_v58 = vpack.c.bf16 %v176_v57, %v175_v56  ;;  %v1489_v62 = vpack.c.bf16 %v178_v60, %v177_v59  ;;  %v1536_v1 = vld [vmem:[#allocation9 + $0x8] sm:$0xff]  }
  0x6a   :  { %vm402_vm7 = vc.u32 %v1849_v6, %v1851_v7  ;;  %v403_v11 = vadd.s32 1, %v1852_v9  ;;  %v401_v23 = vadd.s32 %v1851_v7, %v1849_v6  ;;  %v1537_v6 = vld [vmem:[#allocation9 + $0x10] sm:$0xff]   ;;  %v1538_v7 = vld [vmem:[#allocation9 + $0x18] sm:$0xff]  }
  0x6c   :  { %v404_v12 = vsel %vm402_vm7, %v403_v11, %v1852_v9  ;;  %v1291_v9 = vld [vmem:[%s2074_s3] ss:$0 sm:$0xff] }
  0x6d   :  { %v405_v13 = vadd.s32 %v404_v12, %v400_v10  ;;  %v1297_v10 = vld [vmem:[%s2074_s3 + $0x2] ss:$0 sm:$0xff] }
  0x6f   :  { %v406_v14 = vadd.s32 536870912, %v405_v13 }
  0x71   :  { %v407_v15 = vshrl.u32 %v406_v14, 30 }
  0x73   :  { %v408_v16 = vshll.u32 %v407_v15, 30  ;;  %v431_v42 = vsub.s32 4, %v407_v15 }
  0x75   :  { %v409_v18 = vsub.s32 %v405_v13, %v408_v16  ;;  %v432_v45 = vsel %vm347_vm9, %v431_v42, %v407_v15 }
  0x76   :  { %v434_v47 = vsel %vm346_vm10, 0, %v432_v45 }
  0x77   :  { %v411_v19 = vsub.s32 0, %v409_v18  ;;  %v438_v48 = vand.u32 3, %v434_v47 }
  0x79   :  { %v1300_v20 = vmin.u32 %v411_v19, %v409_v18  ;;  %vm443_vm11 = vcmp.eq.s32.totalorder %v438_v48, 2  ;;  %vm440_vm12 = vcmp.eq.s32.totalorder %v438_v48, 0  ;;  %vm439_vm13 = vcmp.lt.s32.totalorder %v438_v48, 2  ;;  %v1539_v48 = vld [vmem:[#allocation6 + $0x10] sm:$0xff]  }
  0x7b   :  { %v413_v21 = vclz %v1300_v20 }
  0x7d   :  { %v1301_v22 = vadd.s32 4294967294, %v413_v21 }
  0x7f   :  { %vm1302_vm8 = vcmp.lt.s32.totalorder %v1301_v22, 0 }
  0x80   :  { %v416_v24 = vsel %vm1302_vm8, 0, %v1301_v22 }
  0x81   :  { %v417_v25 = vsub.s32 32, %v416_v24  ;;  %v418_v26 = vshll.u32 %v409_v18, %v416_v24  ;;  %v421_v27 = vsub.s32 4294967266, %v416_v24  ;;  %v1294_v18 = vld [vmem:[%s2074_s3 + $0x1] ss:$0 sm:$0xff] }
  0x83   :  { %v419_v28 = vshrl.u32 %v401_v23, %v417_v25  ;;  %v422_v29 = vadd.s32 127, %v421_v27 }
  0x85   :  { %v420_v30 = vor.u32 %v419_v28, %v418_v26  ;;  %v423_v32 = vshll.u32 %v422_v29, 23 }
  0x87   :  { %v424_v34 = vor.u32 4788187, %v423_v32  ;;  %v427_v36 = vcvt.s32.f32 %v420_v30  ;;  %v1306_v30 = vld [vmem:[%s2076_s5] ss:$0 sm:$0xff] }
  0x89   :  { %v425_v38 = vand.u32 2147483647, %v424_v34 }
  0x8b   :  { %v428_v40 = vmul.f32 %v427_v36, %v425_v38 }
  0x8d   :  { %v429_v41 = vxor.u32 2147483648, %v428_v40 }
  0x8f   :  { %v430_v43 = vsel %vm347_vm9, %v429_v41, %v428_v40 }
  0x90   :  { %v433_v44 = vsel %vm346_vm10, %v1821_v8, %v430_v43  ;;  %v1533_v8 = vld [vmem:[#allocation6] sm:$0xff]  }
  0x91   :  { %1551 = vcosq.f32 %v433_v44 }
  0x92   :  { %1553 = vsinq.f32 %v433_v44 }
  0x9b   :  { %v1552_v49 = vpop.eup %1551 }
  0x9c   :  { %v1554_v50 = vpop.eup %1553  ;;  %v444_v51 = vxor.u32 2147483648, %v1552_v49 }
  0x9d   :  { %v441_v52 = vxor.u32 2147483648, %v1554_v50 }
  0x9e   :  { %v445_v17 = vsel %vm443_vm11, %v444_v51, %v1554_v50 }
  0x9f   :  { %v442_v53 = vsel %vm440_vm12, %v1552_v49, %v441_v52  ;;  %v1540_v49 = vld [vmem:[#allocation6 + $0x18] sm:$0xff]  }
  0xa0   :  { %v446_v54 = vsel %vm439_vm13, %v442_v53, %v445_v17 }
  0xa1   :  { %v447_v55 = vsel %vm437_vm14, nan, %v446_v54 }
  0xa2   :  { %448 = vst.msk [vmem:[#allocation11] sm:$0xff] %vm99_vm15, %v447_v55  ;;  %v449_v0 = vpack.c.bf16 %v447_v55, %v447_v55 }
  0xbf   :  { %v98_v61 = vpop.permute.xlu0 %97 }
  0xc0   :  { %1395 = vmatmul.mubr.msk.f32.vlgmr.msra.gmra.mrb[0].mxu1 %vm99_vm15, %v98_v61  ;;  %1417 = vmatmul.mubr.msk.f32.vlgmr.msra.gmra.mrb[0].mxu0 %vm99_vm15, %v98_v61 }
  0xc1   :  { %1487 = vmatpush3.bf16.msra.mxu1 %v1486_v58  ;;  %1405 = vmatprep.mubr.msk.f32.mxu1 %vm1706_vm1, %v1707_v3 }
  0xc2   :  { %1488 = vmatprep.subr.bf16.mxu1 %v1705_v2  ;;  %1435 = vmatprep.mubr.msk.bf16.mxu0 %vm1706_vm1, %v1707_v3  ;;  %v1535_v2 = vld [vmem:[#allocation9] sm:$0xff]  }
  0xc3   :  { %1428 = vmatpush3.bf16.msra.mxu0 %v1535_v2 }
  0xc4   :  { %1429 = vmatprep.subr.bf16.mxu0 %v1707_v3 }
  0xc5   :  { %1490 = vmatpush3.bf16.msra.mxu1 %v1489_v62 }
  0xc6   :  { %1419 = vmatprep.subr.bf16.mxu1 %v1707_v3 }
  0xc7   :  { %1430 = vmatpush3.bf16.msra.mxu0 %v1536_v1 }
  0xc8   :  { %1406 = vmatmul.mubr.msk.f32.vlgmr.msra.gmra.mrb[2].mxu1 %vm99_vm15, %v98_v61  ;;  %1431 = vmatprep.subr.bf16.mxu0 %v1707_v3 }
  0xc9   :  { %1420 = vmatpush3.bf16.msra.mxu1 %v1533_v8  ;;  %1423 = vmatprep.mubr.msk.bf16.mxu1 %vm1706_vm1, %v1707_v3 }
  0xca   :  { %1421 = vmatprep.subr.bf16.mxu1 %v1707_v3 }
  0xcb   :  { %1432 = vmatpush3.bf16.msra.mxu0 %v1537_v6 }
  0xcc   :  { %1433 = vmatprep.subr.bf16.mxu0 %v1707_v3 }
  0xcd   :  { %1422 = vmatpush3.bf16.msra.mxu1 %v1534_v63 }
  0xce   :  { %1439 = vmatprep.subr.bf16.mxu1 %v1707_v3 }
  0xcf   :  { %1434 = vmatpush3.bf16.msra.mxu0 %v1538_v7 }
  0xd0   :  { %1424 = vmatmul.mubr.msk.bf16.vlgmr.msra.gmra.mrb[4].mxu1 %vm99_vm15, %v449_v0  ;;  %1459 = vmatprep.subr.bf16.mxu0 %v1707_v3 }
  0xd1   :  { %1443 = vmatprep.mubr.msk.bf16.mxu1 %vm1706_vm1, %v1707_v3  ;;  %1440 = vmatpush3.bf16.msra.mxu1 %v1539_v48 }
  0xd2   :  { %1441 = vmatprep.subr.bf16.mxu1 %v1707_v3 }
  0xd5   :  { %1442 = vmatpush3.bf16.msra.mxu1 %v1540_v49 }
  0xd6   :  { %1447 = vmatprep.subr.bf16.mxu1 %v1707_v3 }
 0x193   :  { %v168_v11 = vpop.f32.mrb[0].mxu1  ;;  %v338_v12 = vpop.f32.mrb[0].mxu0 }
 0x194   :  { %v169_v13 = vadd.f32 %v1291_v9, %v168_v11  ;;  %v339_v14 = vadd.f32 %v1297_v10, %v338_v12  ;;  %v1396_v15 = vpop.f32.mrb[1].mxu1  ;;  %v1418_v16 = vpop.f32.mrb[1].mxu0 }
 0x196   :  { %173 = vst.msk [vmem:[#allocation2] sm:$0xff] %vm172_vm0, %v169_v13  ;;  %343 = vst.msk [vmem:[#allocation2 + $0x10] sm:$0xff] %vm172_vm0, %v339_v14 }
 0x19b   :  { %v253_v19 = vpop.f32.mrb[2].mxu1 }
 0x19c   :  { %v254_v20 = vadd.f32 %v1294_v18, %v253_v19  ;;  %v1407_v21 = vpop.f32.mrb[3].mxu1 }
 0x19d   :  { %v454_v22 = vld [vmem:[#allocation2] sm:$0xff] }
 0x19e   :  { %258 = vst.msk [vmem:[#allocation2 + $0x8] sm:$0xff] %vm172_vm0, %v254_v20 }
 0x1a3   :  { %v504_v23 = vpop.f32.mrb[4].mxu1 }
 0x1a4   :  { %v505_v24 = vadd.f32 %v504_v23, %v454_v22  ;;  %v1425_v25 = vpop.f32.mrb[5].mxu1 }
 0x1a5   :  { %v507_v26 = vpop.f32.mrb[6].mxu1 }
 0x1a6   :  { %v510_v27 = vmax.f32 %v505_v24, 0.0  ;;  %v1426_v28 = vpop.f32.mrb[7].mxu1 }
 0x1a8   :  { %v511_v29 = vpack.c.bf16 %v510_v27, %v510_v27 }
 0x1aa   :  { %1436 = vmatmul.mubr.msk.bf16.vlgmr.msra.gmra.mrb[4].mxu0 %vm172_vm0, %v511_v29 }
 0x1ab   :  { %1463 = vmatprep.mubr.msk.bf16.mxu0 %vm1706_vm1, %v1707_v3 }
 0x27d   :  { %v588_v32 = vpop.f32.mrb[4].mxu0 }
 0x27e   :  { %v589_v34 = vadd.f32 %v1306_v30, %v588_v32  ;;  %v1437_v36 = vpop.f32.mrb[5].mxu0 }
 0x27f   :  { %v591_v38 = vpop.f32.mrb[6].mxu0 }
 0x280   :  { %594 = vst.msk [vmem:[#allocation11 + $0x8] sm:$0xff] %vm172_vm0, %v589_v34  ;;  %602 = vrot.lane.b32.xlu0 %v589_v34, %s1715_s29  ;;  %v1438_v40 = vpop.f32.mrb[7].mxu0  ;;  %v1312_v41 = vmul.f32 -1.442695, %v589_v34 }
 0x282   :  { %1555 = vpow2.f32 %v1312_v41 }
 0x28c   :  { %v1556_v42 = vpop.eup %1555 }
 0x28d   :  { %v598_v43 = vadd.f32 1.0, %v1556_v42 }
 0x28f   :  { %1557 = vrcp.f32 %v598_v43 }
 0x299   :  { %v1558_v44 = vpop.eup %1557 }
 0x2f2   :  { %v603_v45 = vpop.permute.xlu0 %602 }
 0x2f3   :  { %v605_v47 = vmul.f32 %v1558_v44, %v603_v45 }
 0x2f5   :  { %607 = vrot.lane.b32.xlu1 %v605_v47, %s1708_s4 }
 0x367   :  { %v608_v50 = vpop.permute.xlu1 %607 }
 0x368   :  { %v1908_v51 = vsub.f32 %v1815_v5, %v608_v50 }
 0x36a   :  { %v1912_v52 = vadd.f32 %v1908_v51, %v1813_v4 }
 0x36c   :  { %v615_v17 = vand.u32 2139095040, %v1912_v52  ;;  %v612_v56 = vand.u32 2147483647, %v1912_v52  ;;  %vm614_vm9 = vcmp.lt.s32.totalorder %v1912_v52, 0  ;;  %vm704_vm14 = vweird.f32 %v1912_v52 }
 0x36e   :  { %v616_v53 = vshrl.u32 %v615_v17, 23  ;;  %v619_v59 = vand.u32 8388607, %v612_v56  ;;  %vm613_vm10 = vcmp.le.f32.partialorder %v612_v56, 0.7853982 }
 0x370   :  { %v1313_v54 = vadd.s32 4294967169, %v616_v53  ;;  %v620_v10 = vor.u32 8388608, %v619_v59 }
 0x372   :  { %v622_v55 = vadd.s32 1, %v1313_v54  ;;  %v660_v25 = vshll.u32 %v620_v10, 8 }
 0x374   :  { %vm623_vm2 = vcmp.gt.s32.totalorder %v622_v55, 0 }
 0x375   :  { %v624_v57 = vsel %vm623_vm2, %v622_v55, 0 }
 0x376   :  { %v626_v58 = vand.u32 31, %v624_v57  ;;  %v625_v5 = vshrl.u32 %v624_v57, 5 }
 0x378   :  { %v627_v60 = vsub.s32 32, %v626_v58  ;;  %v629_v61 = vshll.u32 %v1709_v31, %v626_v58  ;;  %v632_v62 = vshll.u32 %v1710_v33, %v626_v58  ;;  %v635_v0 = vshll.u32 %v1711_v35, %v626_v58 }
 0x379   :  { %v638_v1 = vshll.u32 %v1712_v37, %v626_v58  ;;  %v641_v7 = vshll.u32 %v1713_v39, %v626_v58  ;;  %vm644_vm3 = vcmp.lt.s32.totalorder %v625_v5, 1  ;;  %vm647_vm4 = vcmp.lt.s32.totalorder %v625_v5, 4 }
 0x37a   :  { %v630_v8 = vshrl.u32 %v1710_v33, %v627_v60  ;;  %v633_v63 = vshrl.u32 %v1711_v35, %v627_v60  ;;  %v636_v2 = vshrl.u32 %v1712_v37, %v627_v60  ;;  %v639_v6 = vshrl.u32 %v1713_v39, %v627_v60 }
 0x37b   :  { %v642_v9 = vshrl.u32 %v1714_v46, %v627_v60  ;;  %v628_v20 = vshrl.u32 %v1709_v31, %v627_v60  ;;  %vm646_vm5 = vcmp.lt.s32.totalorder %v625_v5, 3  ;;  %vm645_vm6 = vcmp.lt.s32.totalorder %v625_v5, 2 }
 0x37c   :  { %v631_v11 = vor.u32 %v630_v8, %v629_v61  ;;  %v634_v12 = vor.u32 %v633_v63, %v632_v62  ;;  %v637_v13 = vor.u32 %v636_v2, %v635_v0  ;;  %v640_v14 = vor.u32 %v639_v6, %v638_v1 }
 0x37d   :  { %v643_v15 = vor.u32 %v642_v9, %v641_v7 }
 0x37e   :  { %v649_v16 = vsel %vm647_vm4, %v637_v13, 2102212464  ;;  %v652_v18 = vsel %vm644_vm3, %v631_v11, %v634_v12  ;;  %v656_v19 = vsel %vm644_vm3, %v634_v12, %v637_v13  ;;  %v653_v21 = vsel %vm647_vm4, %v640_v14, 920167782 }
 0x37f   :  { %v657_v22 = vsel %vm647_vm4, %v643_v15, 1326507024  ;;  %v654_v23 = vsel %vm646_vm5, %v637_v13, %v653_v21  ;;  %v648_v26 = vsel %vm644_vm3, %v628_v20, %v631_v11  ;;  %v650_v27 = vsel %vm646_vm5, %v634_v12, %v649_v16  ;;  %v1541_v21 = vld [vmem:[#allocation9 + $0x20] sm:$0xff]  }
 0x380   :  { %v658_v24 = vsel %vm646_vm5, %v640_v14, %v657_v22  ;;  %v655_v28 = vsel %vm645_vm6, %v652_v18, %v654_v23  ;;  %v651_v38 = vsel %vm645_vm6, %v648_v26, %v650_v27  ;;  %v1542_v23 = vld [vmem:[#allocation9 + $0x28] sm:$0xff]  }
 0x381   :  { %v659_v29 = vsel %vm645_vm6, %v656_v19, %v658_v24  ;;  %v1932_v34 = vmul.u32.u64.low %v660_v25, %v655_v28  ;;  %v1933_v36 = vmul.u32.u64.high %v660_v25, %v655_v28, %v1932_v34  ;;  %v667_v41 = vmul.u32 %v660_v25, %v651_v38  ;;  %v1544_v24 = vld [vmem:[#allocation9 + $0x38] sm:$0xff]  }
 0x382   :  { %v1929_v30 = vmul.u32.u64.low %v660_v25, %v659_v29  ;;  %v1930_v32 = vmul.u32.u64.high %v660_v25, %v659_v29, %v1929_v30  ;;  %v727_v25 = vld [vmem:[#allocation2 + $0x8] sm:$0xff] }
 0x383   :  { %v670_v40 = vadd.s32 1, %v1933_v36 }
 0x384   :  { %vm669_vm7 = vc.u32 %v1930_v32, %v1932_v34  ;;  %v668_v55 = vadd.s32 %v1932_v34, %v1930_v32 }
 0x385   :  { %v671_v42 = vsel %vm669_vm7, %v670_v40, %v1933_v36  ;;  %v1321_v36 = vld [vmem:[%s2076_s5 + $0x1] ss:$0 sm:$0xff] }
 0x386   :  { %v672_v43 = vadd.s32 %v671_v42, %v667_v41 }
 0x388   :  { %v673_v44 = vadd.s32 536870912, %v672_v43 }
 0x38a   :  { %v674_v45 = vshrl.u32 %v673_v44, 30 }
 0x38c   :  { %v675_v47 = vshll.u32 %v674_v45, 30  ;;  %v698_v7 = vsub.s32 4, %v674_v45 }
 0x38e   :  { %v676_v48 = vsub.s32 %v672_v43, %v675_v47  ;;  %v699_v10 = vsel %vm614_vm9, %v698_v7, %v674_v45 }
 0x38f   :  { %v701_v11 = vsel %vm613_vm10, 0, %v699_v10 }
 0x390   :  { %v678_v49 = vsub.s32 0, %v676_v48  ;;  %v705_v12 = vand.u32 3, %v701_v11 }
 0x392   :  { %v1314_v50 = vmin.u32 %v678_v49, %v676_v48  ;;  %vm710_vm11 = vcmp.eq.s32.totalorder %v705_v12, 2  ;;  %vm707_vm12 = vcmp.eq.s32.totalorder %v705_v12, 0  ;;  %vm706_vm13 = vcmp.lt.s32.totalorder %v705_v12, 2 }
 0x394   :  { %v680_v17 = vclz %v1314_v50 }
 0x396   :  { %v1315_v53 = vadd.s32 4294967294, %v680_v17  ;;  %v1545_v17 = vld [vmem:[#allocation6 + $0x20] sm:$0xff]  }
 0x397   :  { %1460 = vmatpush3.bf16.msra.mxu0 %v1545_v17 }
 0x398   :  { %vm1316_vm8 = vcmp.lt.s32.totalorder %v1315_v53, 0  ;;  %1461 = vmatprep.subr.bf16.mxu0 %v1707_v3 }
 0x399   :  { %v683_v54 = vsel %vm1316_vm8, 0, %v1315_v53  ;;  %v1546_v53 = vld [vmem:[#allocation6 + $0x28] sm:$0xff]  }
 0x39a   :  { %v684_v57 = vsub.s32 32, %v683_v54  ;;  %v688_v58 = vsub.s32 4294967266, %v683_v54  ;;  %v685_v59 = vshll.u32 %v676_v48, %v683_v54 }
 0x39b   :  { %1462 = vmatpush3.bf16.msra.mxu0 %v1546_v53 }
 0x39c   :  { %v686_v60 = vshrl.u32 %v668_v55, %v684_v57  ;;  %v689_v5 = vadd.s32 127, %v688_v58  ;;  %1467 = vmatprep.subr.bf16.mxu0 %v1707_v3 }
 0x39e   :  { %v687_v61 = vor.u32 %v686_v60, %v685_v59  ;;  %v690_v62 = vshll.u32 %v689_v5, 23 }
 0x3a0   :  { %v691_v8 = vor.u32 4788187, %v690_v62  ;;  %v694_v0 = vcvt.s32.f32 %v687_v61 }
 0x3a2   :  { %v692_v63 = vand.u32 2147483647, %v691_v8 }
 0x3a4   :  { %v695_v2 = vmul.f32 %v694_v0, %v692_v63 }
 0x3a6   :  { %v696_v1 = vxor.u32 2147483648, %v695_v2 }
 0x3a8   :  { %v697_v6 = vsel %vm614_vm9, %v696_v1, %v695_v2 }
 0x3a9   :  { %v700_v9 = vsel %vm613_vm10, %v1912_v52, %v697_v6  ;;  %v1543_v52 = vld [vmem:[#allocation9 + $0x30] sm:$0xff]  }
 0x3aa   :  { %1559 = vcosq.f32 %v700_v9 }
 0x3ab   :  { %1561 = vsinq.f32 %v700_v9 }
 0x3b4   :  { %v1560_v13 = vpop.eup %1559 }
 0x3b5   :  { %v1562_v14 = vpop.eup %1561  ;;  %v711_v15 = vxor.u32 2147483648, %v1560_v13 }
 0x3b6   :  { %v708_v16 = vxor.u32 2147483648, %v1562_v14 }
 0x3b7   :  { %v712_v18 = vsel %vm710_vm11, %v711_v15, %v1562_v14 }
 0x3b8   :  { %v709_v19 = vsel %vm707_vm12, %v1560_v13, %v708_v16 }
 0x3b9   :  { %v713_v56 = vsel %vm706_vm13, %v709_v19, %v712_v18 }
 0x3ba   :  { %v1944_v20 = vsel %vm704_vm14, nan, %v713_v56 }
 0x3bb   :  { %v721_v22 = vpack.c.bf16 %v1944_v20, %v1944_v20 }
 0x3bd   :  { %1444 = vmatmul.mubr.msk.bf16.vlgmr.msra.gmra.mrb[8].mxu1 %vm99_vm15, %v721_v22 }
 0x3be   :  { %1448 = vmatpush3.bf16.msra.mxu1 %v1541_v21  ;;  %1455 = vmatprep.mubr.msk.bf16.mxu1 %vm1706_vm1, %v1707_v3 }
 0x3bf   :  { %1449 = vmatprep.subr.bf16.mxu1 %v1707_v3 }
 0x3c2   :  { %1450 = vmatpush3.bf16.msra.mxu1 %v1542_v23 }
 0x3c3   :  { %1451 = vmatprep.subr.bf16.mxu1 %v1707_v3 }
 0x3c6   :  { %1452 = vmatpush3.bf16.msra.mxu1 %v1543_v52 }
 0x3c7   :  { %1453 = vmatprep.subr.bf16.mxu1 %v1707_v3 }
 0x3ca   :  { %1454 = vmatpush3.bf16.msra.mxu1 %v1544_v24 }
 0x490   :  { %v777_v26 = vpop.f32.mrb[8].mxu1 }
 0x491   :  { %v778_v27 = vadd.f32 %v777_v26, %v727_v25  ;;  %v1445_v28 = vpop.f32.mrb[9].mxu1 }
 0x492   :  { %v780_v29 = vpop.f32.mrb[10].mxu1 }
 0x493   :  { %v783_v30 = vmax.f32 %v778_v27, 0.0  ;;  %v1446_v32 = vpop.f32.mrb[11].mxu1 }
 0x495   :  { %v784_v34 = vpack.c.bf16 %v783_v30, %v783_v30 }
 0x497   :  { %1456 = vmatmul.mubr.msk.bf16.vlgmr.msra.gmra.mrb[12].mxu1 %vm172_vm0, %v784_v34 }
 0x56a   :  { %v863_v38 = vpop.f32.mrb[12].mxu1 }
 0x56b   :  { %v1958_v40 = vadd.f32 %v1321_v36, %v863_v38  ;;  %v1457_v41 = vpop.f32.mrb[13].mxu1 }
 0x56c   :  { %v866_v42 = vpop.f32.mrb[14].mxu1 }
 0x56d   :  { %880 = vrot.lane.b32.xlu1 %v1958_v40, %s1715_s29  ;;  %v1458_v43 = vpop.f32.mrb[15].mxu1  ;;  %v1327_v44 = vmul.f32 -1.442695, %v1958_v40 }
 0x56f   :  { %1563 = vpow2.f32 %v1327_v44 }
 0x579   :  { %v1564_v45 = vpop.eup %1563 }
 0x57a   :  { %v877_v47 = vadd.f32 1.0, %v1564_v45 }
 0x57c   :  { %1565 = vrcp.f32 %v877_v47 }
 0x586   :  { %v1566_v48 = vpop.eup %1565 }
 0x5df   :  { %v881_v49 = vpop.permute.xlu1 %880 }
 0x5e0   :  { %v883_v50 = vmul.f32 %v1566_v48, %v881_v49 }
 0x5e2   :  { %885 = vrot.lane.b32.xlu0 %v883_v50, %s1708_s4 }
 0x654   :  { %v886_v54 = vpop.permute.xlu0 %885 }
 0x655   :  { %v1967_v55 = vsub.f32 %v1908_v51, %v886_v54 }
 0x657   :  { %v1971_v57 = vadd.f32 %v1967_v55, %v1813_v4 }
 0x659   :  { %v893_v58 = vand.u32 2139095040, %v1971_v57  ;;  %v890_v61 = vand.u32 2147483647, %v1971_v57  ;;  %vm892_vm9 = vcmp.lt.s32.totalorder %v1971_v57, 0  ;;  %vm982_vm14 = vweird.f32 %v1971_v57 }
 0x65b   :  { %v894_v59 = vshrl.u32 %v893_v58, 23  ;;  %v897_v63 = vand.u32 8388607, %v890_v61  ;;  %vm891_vm10 = vcmp.le.f32.partialorder %v890_v61, 0.7853982 }
 0x65d   :  { %v1328_v60 = vadd.s32 4294967169, %v894_v59  ;;  %v898_v15 = vor.u32 8388608, %v897_v63 }
 0x65f   :  { %v900_v5 = vadd.s32 1, %v1328_v60  ;;  %v938_v29 = vshll.u32 %v898_v15, 8 }
 0x661   :  { %vm901_vm2 = vcmp.gt.s32.totalorder %v900_v5, 0 }
 0x662   :  { %v902_v62 = vsel %vm901_vm2, %v900_v5, 0 }
 0x663   :  { %v904_v8 = vand.u32 31, %v902_v62  ;;  %v903_v51 = vshrl.u32 %v902_v62, 5 }
 0x665   :  { %v905_v0 = vsub.s32 32, %v904_v8  ;;  %v907_v2 = vshll.u32 %v1709_v31, %v904_v8  ;;  %v910_v1 = vshll.u32 %v1710_v33, %v904_v8  ;;  %v913_v9 = vshll.u32 %v1711_v35, %v904_v8 }
 0x666   :  { %v916_v11 = vshll.u32 %v1712_v37, %v904_v8  ;;  %v919_v13 = vshll.u32 %v1713_v39, %v904_v8  ;;  %vm922_vm3 = vcmp.lt.s32.totalorder %v903_v51, 1  ;;  %vm925_vm4 = vcmp.lt.s32.totalorder %v903_v51, 4 }
 0x667   :  { %v908_v6 = vshrl.u32 %v1710_v33, %v905_v0  ;;  %v911_v7 = vshrl.u32 %v1711_v35, %v905_v0  ;;  %v914_v10 = vshrl.u32 %v1712_v37, %v905_v0  ;;  %v917_v12 = vshrl.u32 %v1713_v39, %v905_v0 }
 0x668   :  { %v920_v14 = vshrl.u32 %v1714_v46, %v905_v0  ;;  %v906_v24 = vshrl.u32 %v1709_v31, %v905_v0  ;;  %vm924_vm5 = vcmp.lt.s32.totalorder %v903_v51, 3  ;;  %vm923_vm6 = vcmp.lt.s32.totalorder %v903_v51, 2 }
 0x669   :  { %v909_v16 = vor.u32 %v908_v6, %v907_v2  ;;  %v912_v18 = vor.u32 %v911_v7, %v910_v1  ;;  %v915_v19 = vor.u32 %v914_v10, %v913_v9  ;;  %v918_v56 = vor.u32 %v917_v12, %v916_v11 }
 0x66a   :  { %v921_v21 = vor.u32 %v920_v14, %v919_v13 }
 0x66b   :  { %v927_v22 = vsel %vm925_vm4, %v915_v19, 2102212464  ;;  %v930_v23 = vsel %vm922_vm3, %v909_v16, %v912_v18  ;;  %v934_v52 = vsel %vm922_vm3, %v912_v18, %v915_v19  ;;  %v931_v25 = vsel %vm925_vm4, %v918_v56, 920167782 }
 0x66c   :  { %v935_v26 = vsel %vm925_vm4, %v921_v21, 1326507024  ;;  %v932_v27 = vsel %vm924_vm5, %v915_v19, %v931_v25  ;;  %v926_v30 = vsel %vm922_vm3, %v906_v24, %v909_v16  ;;  %v928_v32 = vsel %vm924_vm5, %v912_v18, %v927_v22 }
 0x66d   :  { %v936_v28 = vsel %vm924_vm5, %v918_v56, %v935_v26  ;;  %v933_v34 = vsel %vm923_vm6, %v930_v23, %v932_v27  ;;  %v929_v44 = vsel %vm923_vm6, %v926_v30, %v928_v32  ;;  %v1547_v27 = vld [vmem:[#allocation9 + $0x40] sm:$0xff]   ;;  %v1549_v30 = vld [vmem:[#allocation9 + $0x50] sm:$0xff]  }
 0x66e   :  { %v937_v36 = vsel %vm923_vm6, %v934_v52, %v936_v28  ;;  %v1991_v42 = vmul.u32.u64.low %v938_v29, %v933_v34  ;;  %v1992_v43 = vmul.u32.u64.high %v938_v29, %v933_v34, %v1991_v42  ;;  %v945_v47 = vmul.u32 %v938_v29, %v929_v44  ;;  %v1005_v32 = vld [vmem:[#allocation2 + $0x10] sm:$0xff] }
 0x66f   :  { %v1988_v38 = vmul.u32.u64.low %v938_v29, %v937_v36  ;;  %v1989_v41 = vmul.u32.u64.high %v938_v29, %v937_v36, %v1988_v38  ;;  %v1548_v29 = vld [vmem:[#allocation9 + $0x48] sm:$0xff]  }
 0x670   :  { %v948_v45 = vadd.s32 1, %v1992_v43 }
 0x671   :  { %vm947_vm7 = vc.u32 %v1989_v41, %v1991_v42  ;;  %v946_v8 = vadd.s32 %v1991_v42, %v1989_v41 }
 0x672   :  { %v949_v48 = vsel %vm947_vm7, %v948_v45, %v1992_v43  ;;  %v1336_v45 = vld [vmem:[%s2076_s5 + $0x2] ss:$0 sm:$0xff]  ;;  %s1716_s5 = smov [#allocation11]  }
 0x673   :  { %v950_v49 = vadd.s32 %v949_v48, %v945_v47 }
 0x675   :  { %v951_v50 = vadd.s32 536870912, %v950_v49 }
 0x677   :  { %v952_v17 = vshrl.u32 %v951_v50, 30 }
 0x679   :  { %v953_v53 = vshll.u32 %v952_v17, 30  ;;  %v976_v15 = vsub.s32 4, %v952_v17 }
 0x67b   :  { %v954_v54 = vsub.s32 %v950_v49, %v953_v53  ;;  %v977_v18 = vsel %vm892_vm9, %v976_v15, %v952_v17 }
 0x67c   :  { %v979_v19 = vsel %vm891_vm10, 0, %v977_v18 }
 0x67d   :  { %v956_v58 = vsub.s32 0, %v954_v54  ;;  %v983_v56 = vand.u32 3, %v979_v19 }
 0x67f   :  { %v1329_v59 = vmin.u32 %v956_v58, %v954_v54  ;;  %vm988_vm11 = vcmp.eq.s32.totalorder %v983_v56, 2  ;;  %vm985_vm12 = vcmp.eq.s32.totalorder %v983_v56, 0  ;;  %vm984_vm13 = vcmp.lt.s32.totalorder %v983_v56, 2 }
 0x681   :  { %v958_v60 = vclz %v1329_v59 }
 0x683   :  { %v1330_v5 = vadd.s32 4294967294, %v958_v60 }
 0x685   :  { %vm1331_vm8 = vcmp.lt.s32.totalorder %v1330_v5, 0 }
 0x686   :  { %v961_v62 = vsel %vm1331_vm8, 0, %v1330_v5 }
 0x687   :  { %v962_v63 = vsub.s32 32, %v961_v62  ;;  %v966_v0 = vsub.s32 4294967266, %v961_v62  ;;  %v963_v51 = vshll.u32 %v954_v54, %v961_v62 }
 0x689   :  { %v964_v2 = vshrl.u32 %v946_v8, %v962_v63  ;;  %v967_v1 = vadd.s32 127, %v966_v0 }
 0x68b   :  { %v965_v6 = vor.u32 %v964_v2, %v963_v51  ;;  %v968_v7 = vshll.u32 %v967_v1, 23 }
 0x68d   :  { %v969_v9 = vor.u32 4788187, %v968_v7  ;;  %v972_v11 = vcvt.s32.f32 %v965_v6 }
 0x68f   :  { %v970_v10 = vand.u32 2147483647, %v969_v9 }
 0x691   :  { %v973_v12 = vmul.f32 %v972_v11, %v970_v10 }
 0x693   :  { %v974_v13 = vxor.u32 2147483648, %v973_v12 }
 0x695   :  { %v975_v14 = vsel %vm892_vm9, %v974_v13, %v973_v12 }
 0x696   :  { %v978_v16 = vsel %vm891_vm10, %v1971_v57, %v975_v14  ;;  %v1550_v57 = vld [vmem:[#allocation9 + $0x58] sm:$0xff]  }
 0x697   :  { %1567 = vcosq.f32 %v978_v16 }
 0x698   :  { %1569 = vsinq.f32 %v978_v16 }
 0x6a1   :  { %v1568_v21 = vpop.eup %1567 }
 0x6a2   :  { %v1570_v22 = vpop.eup %1569  ;;  %v989_v23 = vxor.u32 2147483648, %v1568_v21 }
 0x6a3   :  { %v986_v52 = vxor.u32 2147483648, %v1570_v22 }
 0x6a4   :  { %v990_v24 = vsel %vm988_vm11, %v989_v23, %v1570_v22 }
 0x6a5   :  { %v987_v25 = vsel %vm985_vm12, %v1568_v21, %v986_v52 }
 0x6a6   :  { %v991_v61 = vsel %vm984_vm13, %v987_v25, %v990_v24 }
 0x6a7   :  { %v992_v26 = vsel %vm982_vm14, nan, %v991_v61 }
 0x6a8   :  { %v999_v28 = vpack.c.bf16 %v992_v26, %v992_v26 }
 0x6aa   :  { %1464 = vmatmul.mubr.msk.bf16.vlgmr.msra.gmra.mrb[8].mxu0 %vm99_vm15, %v999_v28  ;;  %vm719_vm15 = vcmask 523520  }
 0x6ab   :  { %1468 = vmatpush3.bf16.msra.mxu0 %v1547_v27  ;;  %1475 = vmatprep.mubr.msk.bf16.mxu0 %vm1706_vm1, %v1707_v3  ;;  %vm83_vm1 = vcmask 1048064  }
 0x6ac   :  { %1469 = vmatprep.subr.bf16.mxu0 %v1707_v3  ;;  %84 = vst.msk [vmem:[#allocation11 + $0x10] sm:$0xff] %vm83_vm1, %v1707_v3 }
 0x6af   :  { %1470 = vmatpush3.bf16.msra.mxu0 %v1548_v29 }
 0x6b0   :  { %1471 = vmatprep.subr.bf16.mxu0 %v1707_v3 }
 0x6b3   :  { %1472 = vmatpush3.bf16.msra.mxu0 %v1549_v30 }
 0x6b4   :  { %1473 = vmatprep.subr.bf16.mxu0 %v1707_v3 }
 0x6b7   :  { %1474 = vmatpush3.bf16.msra.mxu0 %v1550_v57 }
 0x77d   :  { %v1055_v34 = vpop.f32.mrb[8].mxu0 }
 0x77e   :  { %v1056_v36 = vadd.f32 %v1055_v34, %v1005_v32  ;;  %v1465_v38 = vpop.f32.mrb[9].mxu0 }
 0x77f   :  { %v1058_v41 = vpop.f32.mrb[10].mxu0 }
 0x780   :  { %v1061_v42 = vmax.f32 %v1056_v36, 0.0  ;;  %v1466_v43 = vpop.f32.mrb[11].mxu0 }
 0x782   :  { %v1062_v44 = vpack.c.bf16 %v1061_v42, %v1061_v42 }
 0x784   :  { %1476 = vmatmul.mubr.msk.bf16.vlgmr.msra.gmra.mrb[12].mxu0 %vm172_vm0, %v1062_v44 }
 0x857   :  { %v1141_v47 = vpop.f32.mrb[12].mxu0 }
 0x858   :  { %v1142_v48 = vadd.f32 %v1336_v45, %v1141_v47  ;;  %v1477_v49 = vpop.f32.mrb[13].mxu0 }
 0x859   :  { %v1144_v50 = vpop.f32.mrb[14].mxu0 }
 0x85a   :  { %1155 = vrot.lane.b32.xlu1 %v1142_v48, %s1715_s29  ;;  %v1478_v17 = vpop.f32.mrb[15].mxu0  ;;  %1147 = vst.msk [vmem:[#allocation11 + $0x10] sm:$0xff] %vm172_vm0, %v1142_v48  ;;  %v1342_v3 = vmul.f32 -1.442695, %v1142_v48  ;;  %vm997_vm0 = vcmask 785920  }
 0x85c   :  { %1571 = vpow2.f32 %v1342_v3 }
 0x85e   :  { %716 = vrot.lane.b32.xlu1 %v1944_v20, %s1715_s29 }
 0x862   :  { %870 = vrot.lane.b32.xlu1 %v1958_v40, %s1698_s7 }
 0x866   :  { %v1572_v53 = vpop.eup %1571 }
 0x867   :  { %v1151_v54 = vadd.f32 1.0, %v1572_v53 }
 0x869   :  { %1573 = vrcp.f32 %v1151_v54 }
 0x873   :  { %v1574_v58 = vpop.eup %1573 }
 0x8cc   :  { %v1156_v59 = vpop.permute.xlu1 %1155 }
 0x8cd   :  { %v1158_v60 = vmul.f32 %v1574_v58, %v1156_v59 }
 0x8cf   :  { %1160 = vrot.lane.b32.xlu0 %v1158_v60, %s1708_s4 }
 0x8d0   :  { %v717_v5 = vpop.permute.xlu1 %716 }
 0x8d1   :  { %720 = vst.msk [vmem:[#allocation11] sm:$0xff] %vm719_vm15, %v717_v5 }
 0x8d3   :  { %994 = vrot.lane.b32.xlu0 %v992_v26, %s1698_s7  ;;  %s1280_s7 = sshll.u32 %s1716_s5, 4  ;;  %s1281_s7 = int_to_ptr.vmem [resolvable:$true] %s1280_s7 }
 0x8d4   :  { %v871_v62 = vpop.permute.xlu1 %870  ;;  %s1667_s11 = scalar_lea.vmem %s1281_s7, 384  ;;  %p1672_p5 = scmp.lt.s32.totalorder %s1281_s7, %s1281_s7 }
 0x8d5   :  { %873 = vst.msk [vmem:[#allocation11 + $0x8] sm:$0xff] %vm83_vm1, %v871_v62  ;;  %vm1272_vm1 = vcmask 1048320   ;;  %p1668_p4 = scmp.ne.s32.totalorder %s1281_s7, %s1667_s11  ;;  %p1673_p6 = scmp.lt.s32.totalorder %s1667_s11, %s1667_s11 }
 0x8d7   :  { %p1674_p7 = por %p1673_p6, %p1672_p5 }
 0x8d9   :  { %p1675_p8 = pnand %p1674_p7, %p1668_p4 }
 0x941   :  { %v1161_v20 = vpop.permute.xlu0 %1160 }
 0x942   :  { %v1163_v40 = vsub.f32 %v1967_v55, %v1161_v20 }
 0x944   :  { %v2026_v8 = vadd.f32 %v1163_v40, %v1813_v4 }
 0x945   :  { %v995_v63 = vpop.permute.xlu0 %994 }
 0x946   :  { %v1168_v0 = vand.u32 2139095040, %v2026_v8  ;;  %998 = vst.msk [vmem:[#allocation11] sm:$0xff] %vm997_vm0, %v995_v63  ;;  %v1165_v6 = vand.u32 2147483647, %v2026_v8  ;;  %vm1167_vm9 = vcmp.lt.s32.totalorder %v2026_v8, 0  ;;  %vm1257_vm14 = vweird.f32 %v2026_v8 }
 0x948   :  { %v1169_v51 = vshrl.u32 %v1168_v0, 23  ;;  %v1172_v55 = vand.u32 8388607, %v1165_v6  ;;  %vm1166_vm10 = vcmp.le.f32.partialorder %v1165_v6, 0.7853982 }
 0x94a   :  { %v1343_v2 = vadd.s32 4294967169, %v1169_v51  ;;  %v1173_v22 = vor.u32 8388608, %v1172_v55 }
 0x94c   :  { %v1175_v1 = vadd.s32 1, %v1343_v2 }
 0x94e   :  { %vm1176_vm2 = vcmp.gt.s32.totalorder %v1175_v1, 0 }
 0x94f   :  { %v1177_v7 = vsel %vm1176_vm2, %v1175_v1, 0 }
 0x950   :  { %v1179_v9 = vand.u32 31, %v1177_v7  ;;  %v1178_v11 = vshrl.u32 %v1177_v7, 5 }
 0x952   :  { %v1180_v10 = vsub.s32 32, %v1179_v9  ;;  %v1182_v4 = vshll.u32 %v1709_v31, %v1179_v9  ;;  %v1185_v12 = vshll.u32 %v1710_v33, %v1179_v9  ;;  %v1188_v15 = vshll.u32 %v1711_v35, %v1179_v9 }
 0x953   :  { %v1191_v18 = vshll.u32 %v1712_v37, %v1179_v9  ;;  %v1194_v56 = vshll.u32 %v1713_v39, %v1179_v9  ;;  %vm1197_vm3 = vcmp.lt.s32.totalorder %v1178_v11, 1  ;;  %vm1200_vm4 = vcmp.lt.s32.totalorder %v1178_v11, 4 }
 0x954   :  { %v1183_v13 = vshrl.u32 %v1710_v33, %v1180_v10  ;;  %v1186_v14 = vshrl.u32 %v1711_v35, %v1180_v10  ;;  %v1189_v16 = vshrl.u32 %v1712_v37, %v1180_v10  ;;  %v1192_v19 = vshrl.u32 %v1713_v39, %v1180_v10 }
 0x955   :  { %v1195_v21 = vshrl.u32 %v1714_v46, %v1180_v10  ;;  %v1181_v27 = vshrl.u32 %v1709_v31, %v1180_v10  ;;  %vm1199_vm5 = vcmp.lt.s32.totalorder %v1178_v11, 3  ;;  %vm1198_vm6 = vcmp.lt.s32.totalorder %v1178_v11, 2 }
 0x956   :  { %v1184_v23 = vor.u32 %v1183_v13, %v1182_v4  ;;  %v1187_v52 = vor.u32 %v1186_v14, %v1185_v12  ;;  %v1190_v24 = vor.u32 %v1189_v16, %v1188_v15  ;;  %v1193_v25 = vor.u32 %v1192_v19, %v1191_v18 }
 0x957   :  { %v1196_v33 = vor.u32 %v1195_v21, %v1194_v56  ;;  %v1213_v46 = vshll.u32 %v1173_v22, 8 }
 0x958   :  { %v1202_v61 = vsel %vm1200_vm4, %v1190_v24, 2102212464  ;;  %v1205_v35 = vsel %vm1197_vm3, %v1184_v23, %v1187_v52  ;;  %v1209_v26 = vsel %vm1197_vm3, %v1187_v52, %v1190_v24  ;;  %v1206_v37 = vsel %vm1200_vm4, %v1193_v25, 920167782 }
 0x959   :  { %v1210_v28 = vsel %vm1200_vm4, %v1196_v33, 1326507024  ;;  %v1207_v39 = vsel %vm1199_vm5, %v1190_v24, %v1206_v37  ;;  %v1201_v30 = vsel %vm1197_vm3, %v1181_v27, %v1184_v23  ;;  %v1203_v57 = vsel %vm1199_vm5, %v1187_v52, %v1202_v61 }
 0x95a   :  { %v1211_v29 = vsel %vm1199_vm5, %v1193_v25, %v1210_v28  ;;  %v1208_v32 = vsel %vm1198_vm6, %v1205_v35, %v1207_v39  ;;  %v1204_v43 = vsel %vm1198_vm6, %v1201_v30, %v1203_v57 }
 0x95b   :  { %v1212_v34 = vsel %vm1198_vm6, %v1209_v26, %v1211_v29  ;;  %v2046_v41 = vmul.u32.u64.low %v1213_v46, %v1208_v32  ;;  %v2047_v42 = vmul.u32.u64.high %v1213_v46, %v1208_v32, %v2046_v41  ;;  %v1220_v44 = vmul.u32 %v1213_v46, %v1204_v43 }
 0x95c   :  { %v2043_v36 = vmul.u32.u64.low %v1213_v46, %v1212_v34  ;;  %v2044_v38 = vmul.u32.u64.high %v1213_v46, %v1212_v34, %v2043_v36 }
 0x95d   :  { %v1223_v31 = vadd.s32 1, %v2047_v42 }
 0x95e   :  { %vm1222_vm7 = vc.u32 %v2044_v38, %v2046_v41  ;;  %v1221_v60 = vadd.s32 %v2046_v41, %v2044_v38 }
 0x95f   :  { %v1224_v45 = vsel %vm1222_vm7, %v1223_v31, %v2047_v42 }
 0x960   :  { %v1225_v47 = vadd.s32 %v1224_v45, %v1220_v44 }
 0x962   :  { %v1226_v48 = vadd.s32 536870912, %v1225_v47 }
 0x964   :  { %v1227_v49 = vshrl.u32 %v1226_v48, 30 }
 0x966   :  { %v1228_v50 = vshll.u32 %v1227_v49, 30  ;;  %v1251_v11 = vsub.s32 4, %v1227_v49 }
 0x968   :  { %v1229_v17 = vsub.s32 %v1225_v47, %v1228_v50  ;;  %v1252_v12 = vsel %vm1167_vm9, %v1251_v11, %v1227_v49 }
 0x969   :  { %v1254_v13 = vsel %vm1166_vm10, 0, %v1252_v12 }
 0x96a   :  { %v1231_v3 = vsub.s32 0, %v1229_v17  ;;  %v1258_v14 = vand.u32 3, %v1254_v13 }
 0x96c   :  { %v1344_v53 = vmin.u32 %v1231_v3, %v1229_v17  ;;  %vm1263_vm11 = vcmp.eq.s32.totalorder %v1258_v14, 2  ;;  %vm1260_vm12 = vcmp.eq.s32.totalorder %v1258_v14, 0  ;;  %vm1259_vm13 = vcmp.lt.s32.totalorder %v1258_v14, 2 }
 0x96e   :  { %v1233_v54 = vclz %v1344_v53 }
 0x970   :  { %v1345_v58 = vadd.s32 4294967294, %v1233_v54 }
 0x972   :  { %vm1346_vm8 = vcmp.lt.s32.totalorder %v1345_v58, 0 }
 0x973   :  { %v1236_v59 = vsel %vm1346_vm8, 0, %v1345_v58 }
 0x974   :  { %v1237_v5 = vsub.s32 32, %v1236_v59  ;;  %v1241_v62 = vsub.s32 4294967266, %v1236_v59  ;;  %v1238_v20 = vshll.u32 %v1229_v17, %v1236_v59 }
 0x976   :  { %v1239_v40 = vshrl.u32 %v1221_v60, %v1237_v5  ;;  %v1242_v63 = vadd.s32 127, %v1241_v62 }
 0x978   :  { %v1240_v0 = vor.u32 %v1239_v40, %v1238_v20  ;;  %v1243_v51 = vshll.u32 %v1242_v63, 23 }
 0x97a   :  { %v1244_v2 = vor.u32 4788187, %v1243_v51  ;;  %v1247_v7 = vcvt.s32.f32 %v1240_v0 }
 0x97c   :  { %v1245_v1 = vand.u32 2147483647, %v1244_v2 }
 0x97e   :  { %v1248_v9 = vmul.f32 %v1247_v7, %v1245_v1 }
 0x980   :  { %v1249_v10 = vxor.u32 2147483648, %v1248_v9 }
 0x982   :  { %v1250_v55 = vsel %vm1167_vm9, %v1249_v10, %v1248_v9 }
 0x983   :  { %v1253_v4 = vsel %vm1166_vm10, %v2026_v8, %v1250_v55 }
 0x984   :  { %1575 = vcosq.f32 %v1253_v4 }
 0x985   :  { %1577 = vsinq.f32 %v1253_v4 }
 0x98e   :  { %v1576_v15 = vpop.eup %1575 }
 0x98f   :  { %v1578_v16 = vpop.eup %1577  ;;  %v1264_v18 = vxor.u32 2147483648, %v1576_v15 }
 0x990   :  { %v1261_v19 = vxor.u32 2147483648, %v1578_v16 }
 0x991   :  { %v1265_v56 = vsel %vm1263_vm11, %v1264_v18, %v1578_v16 }
 0x992   :  { %v1262_v21 = vsel %vm1260_vm12, %v1576_v15, %v1261_v19 }
 0x993   :  { %v1266_v6 = vsel %vm1259_vm13, %v1262_v21, %v1265_v56 }
 0x994   :  { %v1267_v22 = vsel %vm1257_vm14, nan, %v1266_v6 }
 0x995   :  { %1269 = vrot.lane.b32.xlu0 %v1267_v22, %s1708_s4 }
 0xa07   :  { %v1270_v23 = vpop.permute.xlu0 %1269 }
 0xa08   :  { %1273 = vst.msk [vmem:[#allocation11] sm:$0xff] %vm1272_vm1, %v1270_v23 }
 0xa09   :  { %1678 = shalt.err (!%p1675_p8)
}
 0xa0a   :  { %s1679_s15 = scalar_lea.hbm %s2077_s6, 384 }
 0xa0b   :  { %p1680_p9 = scmp.ne.s32.totalorder %s2077_s6, %s1679_s15  ;;  %p1683_p10 = scmp.lt.u32.totalorder %s1679_s15, %s2077_s6 }
 0xa0d   :  { %p1685_p11 = pnand %p1683_p10, %p1680_p9 }
 0xa0f   :  { %1688 = shalt.err (!%p1685_p11)
}
 0xa10   :  { %1283 = dma.vmem_to_hbm [thread:$0]  %s1281_s7, 384, %s2077_s6, [#allocation5]  }
 0xa11   :  { %1695 = dma.done.wait [#allocation5], 384  }
 0xa12   :  { %1696 = vsyncadd [#allocation5], 4294966912 }
 0xa13   :  { %1287 = vsyncpa [#allocation4], 1 }
 0xa14   :  { %1288 = vsyncpa [#allocation7], 1 }
 0xa15   :  { %1289 = vsyncpa [#allocation10], 1 }
 0xa16   :  { %1290 = vsyncpa [#allocation5], 1 }

</bundles_post_ra>
